<compile_context>
chip_gen: v7x
topology: tpu7x:2x2x1
jax: 0.10.0
libtpu: 0.0.40
codegen_flags: <defaults>
</compile_context>

<pallas_src>
import functools
import math

import jax
import jax.numpy as jnp
from jax.experimental import pallas as pl
from jax.experimental.pallas import tpu as pltpu


# ----------------------------------------------------------------------------
# Tiling / capability helpers
# ----------------------------------------------------------------------------
def _pick_row_tile(m, target=256):
    """Largest multiple-of-8 tile (>= 64) <= target that divides m, else m."""
    if m <= target:
        return m
    for t in range(target - target % 8, 63, -8):
        if m % t == 0:
            return t
    # TODO(synk): pad rows / ragged last block instead of one full-size block.
    return m


def _pick_hidden_tile(h, target=512):
    """Hidden-dim tile: a multiple of 128 that divides h, else full h."""
    if h <= target:
        return h
    for t in range(target - target % 128, 127, -128):
        if h % t == 0:
            return t
    return h


def _vmem_limit(est_bytes):
    """Explicit scoped-VMEM request derived from block sizes (with margin)."""
    return int(min(max(3 * est_bytes + (8 << 20), 32 << 20), 56 << 20))


_BUFFERED_ONE_OK = None


def _probe_buffered_one():
    """Check whether pipeline_mode=pl.Buffered(1) lowers on this JAX/TPU
    (single-buffer grid-invariant operands -> half the weight VMEM)."""
    try:
        spec = pl.BlockSpec((8, 128), lambda i: (0, 0),
                            pipeline_mode=pl.Buffered(1))

        def _k(c_ref, x_ref, o_ref):
            o_ref[...] = x_ref[...] + c_ref[...]

        fn = pl.pallas_call(
            _k,
            out_shape=jax.ShapeDtypeStruct((8, 128), jnp.float32),
            grid=(1,),
            in_specs=[spec, pl.BlockSpec((8, 128), lambda i: (0, 0))],
            out_specs=pl.BlockSpec((8, 128), lambda i: (0, 0)))
        arg = jax.ShapeDtypeStruct((8, 128), jnp.float32)
        jax.jit(fn).lower(arg, arg).compile()
        return True
    except Exception:
        return False


def _const_spec(shape):
    """BlockSpec for a grid-invariant operand (weights / biases)."""
    global _BUFFERED_ONE_OK
    if _BUFFERED_ONE_OK is None:
        _BUFFERED_ONE_OK = _probe_buffered_one()
    idx = lambda *_: (0,) * len(shape)
    if _BUFFERED_ONE_OK:
        return pl.BlockSpec(shape, idx, pipeline_mode=pl.Buffered(1))
    return pl.BlockSpec(shape, idx)


# ----------------------------------------------------------------------------
# In-kernel helpers
# ----------------------------------------------------------------------------
def _layernorm_f32(x, g, b, eps=1e-5):
    x = x.astype(jnp.float32)
    mean = jnp.mean(x, axis=-1, keepdims=True)
    var = jnp.mean(jnp.square(x - mean), axis=-1, keepdims=True)
    xn = (x - mean) * jax.lax.rsqrt(var + eps)
    return xn * g.astype(jnp.float32) + b.astype(jnp.float32)


def _project_kv(src_cdt, wk_ref, bk_ref, wv_ref, bv_ref, k_scr, v_scr):
    f32 = jnp.float32
    k_scr[...] = (jnp.dot(src_cdt, wk_ref[...], preferred_element_type=f32)
                  + bk_ref[...]).astype(k_scr.dtype)
    v_scr[...] = (jnp.dot(src_cdt, wv_ref[...], preferred_element_type=f32)
                  + bv_ref[...]).astype(v_scr.dtype)


def _attention_tile(x_tile, g_ref, b_ref, wq_ref, bq_ref, wo_ref, bo_ref,
                    k_scr, v_scr, ctx_scr, o_ref, *, num_heads, scale):
    """LN + Q projection for one query tile, MHA against resident K/V scratch,
    out-projection, residual add.  Heads are packed along the lane dim; each
    head's context is written into its lane slice of ctx_scr (no concat)."""
    f32 = jnp.float32
    cdt = wq_ref.dtype
    xn = _layernorm_f32(x_tile, g_ref[...], b_ref[...]).astype(cdt)
    q = jnp.dot(xn, wq_ref[...], preferred_element_type=f32) + bq_ref[...]
    q = (q * scale).astype(cdt)                               # (tq, D)
    d = q.shape[-1]
    hd = d // num_heads
    for h in range(num_heads):        # short static loop, fully unrolled
        sl = slice(h * hd, (h + 1) * hd)
        s = jax.lax.dot_general(q[:, sl], k_scr[:, sl],
                                (((1,), (1,)), ((), ())),
                                preferred_element_type=f32)   # (tq, Sk)
        s = s - jnp.max(s, axis=-1, keepdims=True)
        p = jnp.exp(s)
        denom = jnp.sum(p, axis=-1, keepdims=True)
        r = pl.reciprocal(denom, approx=True)                 # EUP slot
        r = r * (2.0 - denom * r)                             # Newton -> ~f32
        p = p * r
        ctx_scr[:, sl] = jnp.dot(p.astype(cdt), v_scr[:, sl],
                                 preferred_element_type=f32
                                 ).astype(ctx_scr.dtype)
    out = (jnp.dot(ctx_scr[...], wo_ref[...], preferred_element_type=f32)
           + bo_ref[...])
    o_ref[...] = (x_tile.astype(f32) + out).astype(o_ref.dtype)


# ----------------------------------------------------------------------------
# Kernels
# ----------------------------------------------------------------------------
def self_attn_block_kernel(x_ref, g_ref, b_ref, wq_ref, bq_ref, wk_ref, bk_ref,
                           wv_ref, bv_ref, wo_ref, bo_ref, o_ref,
                           k_scr, v_scr, ctx_scr, *, num_heads, scale, tq):
    qi = pl.program_id(1)

    @pl.when(qi == 0)
    def _():   # build K/V for the whole sequence of this batch item once
        xn_full = _layernorm_f32(x_ref[...], g_ref[...], b_ref[...]
                                 ).astype(wk_ref.dtype)
        _project_kv(xn_full, wk_ref, bk_ref, wv_ref, bv_ref, k_scr, v_scr)

    row0 = pl.multiple_of(qi * tq, tq)
    x_tile = x_ref[pl.ds(row0, tq), :]
    _attention_tile(x_tile, g_ref, b_ref, wq_ref, bq_ref, wo_ref, bo_ref,
                    k_scr, v_scr, ctx_scr, o_ref,
                    num_heads=num_heads, scale=scale)


def cross_attn_block_kernel(x_ref, enc_ref, g_ref, b_ref, wq_ref, bq_ref,
                            wk_ref, bk_ref, wv_ref, bv_ref, wo_ref, bo_ref,
                            o_ref, k_scr, v_scr, ctx_scr,
                            *, num_heads, scale, tq):
    qi = pl.program_id(1)

    @pl.when(qi == 0)
    def _():   # K/V from the (un-normalized) encoder output, once per item
        enc = enc_ref[...].astype(wk_ref.dtype)
        _project_kv(enc, wk_ref, bk_ref, wv_ref, bv_ref, k_scr, v_scr)

    row0 = pl.multiple_of(qi * tq, tq)
    x_tile = x_ref[pl.ds(row0, tq), :]
    _attention_tile(x_tile, g_ref, b_ref, wq_ref, bq_ref, wo_ref, bo_ref,
                    k_scr, v_scr, ctx_scr, o_ref,
                    num_heads=num_heads, scale=scale)


def ffn_block_kernel(x_ref, g_ref, b_ref, w1_ref, b1_ref, w2_ref, b2_ref,
                     o_ref, xn_scr, acc_scr):
    """LN + Linear + GELU + Linear + residual, tiled over the hidden dim."""
    f32 = jnp.float32
    cdt = w1_ref.dtype
    hi = pl.program_id(1)

    @pl.when(hi == 0)
    def _():
        xn_scr[...] = _layernorm_f32(x_ref[...], g_ref[...], b_ref[...]
                                     ).astype(cdt)
        acc_scr[...] = jnp.zeros_like(acc_scr)

    h = (jnp.dot(xn_scr[...], w1_ref[...], preferred_element_type=f32)
         + b1_ref[...])
    # exact (erf) GELU, matching torch.nn.functional.gelu default
    h = 0.5 * h * (1.0 + jax.lax.erf(h * (1.0 / math.sqrt(2.0))))
    acc_scr[...] += jnp.dot(h.astype(cdt), w2_ref[...],
                            preferred_element_type=f32)

    @pl.when(hi == pl.num_programs(1) - 1)
    def _():
        o_ref[...] = (x_ref[...].astype(f32) + acc_scr[...] + b2_ref[...]
                      ).astype(o_ref.dtype)


# ----------------------------------------------------------------------------
# Pallas wrappers
# ----------------------------------------------------------------------------
def self_attention_block(x, p, ln_g, ln_b, num_heads, *, q_tile_target=256):
    B, S, D = x.shape
    assert D % num_heads == 0
    tq = _pick_row_tile(S, q_tile_target)
    nq = S // tq
    scale = 1.0 / math.sqrt(float(D // num_heads))
    cdt = p["wq"].dtype
    wbytes = jnp.dtype(cdt).itemsize

    kern = functools.partial(self_attn_block_kernel, num_heads=num_heads,
                             scale=scale, tq=tq)
    seq_blk = pl.BlockSpec((pl.Squeezed(), S, D), lambda bi, qi: (bi, 0, 0))
    out_blk = pl.BlockSpec((pl.Squeezed(), tq, D), lambda bi, qi: (bi, qi, 0))
    mat = _const_spec((D, D))
    vec = _const_spec((1, D))

    est = (S * D * 4                               # resident x block
           + 2 * tq * D * 4                        # output tiles (2 buffers)
           + (4 * D * D + 6 * D) * max(wbytes, 4)  # weights + biases + LN
           + (2 * S + tq) * D * wbytes             # K/V/ctx scratch
           + 2 * tq * S * 4)                       # score / prob transients

    return pl.pallas_call(
        kern,
        out_shape=jax.ShapeDtypeStruct((B, S, D), x.dtype),
        grid=(B, nq),
        in_specs=[seq_blk, vec, vec, mat, vec, mat, vec, mat, vec, mat, vec],
        out_specs=out_blk,
        scratch_shapes=[pltpu.VMEM((S, D), cdt),     # K
                        pltpu.VMEM((S, D), cdt),     # V
                        pltpu.VMEM((tq, D), cdt)],   # per-tile context
        compiler_params=pltpu.CompilerParams(
            dimension_semantics=("parallel", "arbitrary"),
            vmem_limit_bytes=_vmem_limit(est)),
        cost_estimate=pl.CostEstimate(
            flops=8 * B * S * D * D + 4 * B * S * S * D,
            transcendentals=B * num_heads * S * S,
            bytes_accessed=4 * 2 * B * S * D + wbytes * 4 * D * D),
    )(x, ln_g.reshape(1, D), ln_b.reshape(1, D),
      p["wq"], p["bq"].reshape(1, D), p["wk"], p["bk"].reshape(1, D),
      p["wv"], p["bv"].reshape(1, D), p["wo"], p["bo"].reshape(1, D))


def cross_attention_block(x, enc, p, ln_g, ln_b, num_heads, *,
                          q_tile_target=256):
    B, Sq, D = x.shape
    Sk = enc.shape[1]
    assert D % num_heads == 0
    tq = _pick_row_tile(Sq, q_tile_target)
    nq = Sq // tq
    scale = 1.0 / math.sqrt(float(D // num_heads))
    cdt = p["wq"].dtype
    wbytes = jnp.dtype(cdt).itemsize

    kern = functools.partial(cross_attn_block_kernel, num_heads=num_heads,
                             scale=scale, tq=tq)
    x_blk = pl.BlockSpec((pl.Squeezed(), Sq, D), lambda bi, qi: (bi, 0, 0))
    enc_blk = pl.BlockSpec((pl.Squeezed(), Sk, D), lambda bi, qi: (bi, 0, 0))
    out_blk = pl.BlockSpec((pl.Squeezed(), tq, D), lambda bi, qi: (bi, qi, 0))
    mat = _const_spec((D, D))
    vec = _const_spec((1, D))

    est = ((Sq + Sk) * D * 4
           + 2 * tq * D * 4
           + (4 * D * D + 6 * D) * max(wbytes, 4)
           + (2 * Sk + tq) * D * wbytes
           + 2 * tq * Sk * 4)

    return pl.pallas_call(
        kern,
        out_shape=jax.ShapeDtypeStruct((B, Sq, D), x.dtype),
        grid=(B, nq),
        in_specs=[x_blk, enc_blk, vec, vec,
                  mat, vec, mat, vec, mat, vec, mat, vec],
        out_specs=out_blk,
        scratch_shapes=[pltpu.VMEM((Sk, D), cdt),
                        pltpu.VMEM((Sk, D), cdt),
                        pltpu.VMEM((tq, D), cdt)],
        compiler_params=pltpu.CompilerParams(
            dimension_semantics=("parallel", "arbitrary"),
            vmem_limit_bytes=_vmem_limit(est)),
        cost_estimate=pl.CostEstimate(
            flops=2 * B * (Sq + Sk) * D * D + 4 * B * D * D * Sq
                  + 4 * B * Sq * Sk * D,
            transcendentals=B * num_heads * Sq * Sk,
            bytes_accessed=4 * (2 * B * Sq * D + B * Sk * D)
                           + wbytes * 4 * D * D),
    )(x, enc, ln_g.reshape(1, D), ln_b.reshape(1, D),
      p["wq"], p["bq"].reshape(1, D), p["wk"], p["bk"].reshape(1, D),
      p["wv"], p["bv"].reshape(1, D), p["wo"], p["bo"].reshape(1, D))


def feed_forward_block(x2d, ln_g, ln_b, w1, b1, w2, b2, *,
                       row_tile_target=256, hidden_tile_target=512):
    M, D = x2d.shape
    H = w1.shape[1]
    tm = _pick_row_tile(M, row_tile_target)
    th = _pick_hidden_tile(H, hidden_tile_target)
    nm, nh = M // tm, H // th
    cdt = w1.dtype
    wbytes = jnp.dtype(cdt).itemsize

    row = pl.BlockSpec((tm, D), lambda i, hi: (i, 0))
    w1_blk = pl.BlockSpec((D, th), lambda i, hi: (0, hi))
    b1_blk = pl.BlockSpec((1, th), lambda i, hi: (0, hi))
    w2_blk = pl.BlockSpec((th, D), lambda i, hi: (hi, 0))
    vec_d = _const_spec((1, D))

    est = (2 * tm * D * 4 * 2
           + 2 * (D * th + th * D + th + D) * max(wbytes, 4)
           + tm * D * (wbytes + 4)
           + 2 * tm * th * 4)

    return pl.pallas_call(
        ffn_block_kernel,
        out_shape=jax.ShapeDtypeStruct((M, D), x2d.dtype),
        grid=(nm, nh),
        in_specs=[row, vec_d, vec_d, w1_blk, b1_blk, w2_blk, vec_d],
        out_specs=row,
        scratch_shapes=[pltpu.VMEM((tm, D), cdt),         # LN(x) tile
                        pltpu.VMEM((tm, D), jnp.float32)],  # accumulator
        input_output_aliases={0: 0},   # residual stream updated in place
        compiler_params=pltpu.CompilerParams(
            dimension_semantics=("parallel", "arbitrary"),
            vmem_limit_bytes=_vmem_limit(est)),
        cost_estimate=pl.CostEstimate(
            flops=4 * M * D * H, transcendentals=M * H,
            bytes_accessed=4 * 2 * M * D + wbytes * 2 * D * H),
    )(x2d, ln_g.reshape(1, D), ln_b.reshape(1, D),
      w1, b1.reshape(1, H), w2, b2.reshape(1, D))


# ----------------------------------------------------------------------------
# Decoder layer (forward of the PyTorch DecoderLayer, pre-norm, eval mode)
# ----------------------------------------------------------------------------
def decoder_layer(x, enc_out, params, num_heads):
    B, S, D = x.shape
    # self-attention block (dropout1 == identity in eval mode)
    x = self_attention_block(x, params["self_attn"],
                             params["ln1_g"], params["ln1_b"], num_heads)
    # cross-attention block (dropout2 == identity)
    x = cross_attention_block(x, enc_out, params["cross_attn"],
                              params["ln2_g"], params["ln2_b"], num_heads)
    # feed-forward block (dropout3 == identity)
    f = params["ffn"]
    x2 = feed_forward_block(x.reshape(B * S, D),
                            params["ln3_g"], params["ln3_b"],
                            f["w1"], f["b1"], f["w2"], f["b2"])
    return x2.reshape(B, S, D)


# ----------------------------------------------------------------------------
# Pure-JAX reference (for correctness check)
# ----------------------------------------------------------------------------
def ref_layernorm(x, g, b):
    m = x.mean(-1, keepdims=True)
    v = ((x - m) ** 2).mean(-1, keepdims=True)
    return (x - m) / jnp.sqrt(v + 1e-5) * g + b


def ref_mha(q, k, v, p, H):
    B, Sq, D = q.shape
    Sk = k.shape[1]
    hd = D // H
    Q = (q @ p["wq"] + p["bq"]).reshape(B, Sq, H, hd).transpose(0, 2, 1, 3)
    K = (k @ p["wk"] + p["bk"]).reshape(B, Sk, H, hd).transpose(0, 2, 1, 3)
    V = (v @ p["wv"] + p["bv"]).reshape(B, Sk, H, hd).transpose(0, 2, 1, 3)
    e = jnp.einsum("bhqd,bhkd->bhqk", Q, K) / jnp.sqrt(jnp.float32(hd))
    a = jax.nn.softmax(e, axis=-1)
    o = jnp.einsum("bhqk,bhkd->bhqd", a, V).transpose(0, 2, 1, 3)
    return o.reshape(B, Sq, D) @ p["wo"] + p["bo"]


def ref_decoder_layer(x, enc, params, H):
    xn = ref_layernorm(x, params["ln1_g"], params["ln1_b"])
    x = x + ref_mha(xn, xn, xn, params["self_attn"], H)
    xn = ref_layernorm(x, params["ln2_g"], params["ln2_b"])
    x = x + ref_mha(xn, enc, enc, params["cross_attn"], H)
    xn = ref_layernorm(x, params["ln3_g"], params["ln3_b"])
    p = params["ffn"]
    h = xn @ p["w1"] + p["b1"]
    h = 0.5 * h * (1.0 + jax.lax.erf(h / jnp.sqrt(2.0)))
    return x + (h @ p["w2"] + p["b2"])


# ----------------------------------------------------------------------------
# Deterministic parameter init (synthetic weights; shapes from __init__)
# ----------------------------------------------------------------------------
def init_attn_params(key, D):
    ks = jax.random.split(key, 8)
    u = 1.0 / math.sqrt(D)
    mk = lambda k, s: jax.random.uniform(k, s, jnp.float32, -u, u)
    return dict(wq=mk(ks[0], (D, D)), bq=mk(ks[1], (D,)),
                wk=mk(ks[2], (D, D)), bk=mk(ks[3], (D,)),
                wv=mk(ks[4], (D, D)), bv=mk(ks[5], (D,)),
                wo=mk(ks[6], (D, D)), bo=mk(ks[7], (D,)))


def init_params(key, D, hidden):
    k1, k2, k3, k4, k5, k6 = jax.random.split(key, 6)
    u1, u2 = 1.0 / math.sqrt(D), 1.0 / math.sqrt(hidden)
    return dict(
        self_attn=init_attn_params(k1, D),
        cross_attn=init_attn_params(k2, D),
        ffn=dict(
            w1=jax.random.uniform(k3, (D, hidden), jnp.float32, -u1, u1),
            b1=jax.random.uniform(k4, (hidden,), jnp.float32, -u1, u1),
            w2=jax.random.uniform(k5, (hidden, D), jnp.float32, -u2, u2),
            b2=jax.random.uniform(k6, (D,), jnp.float32, -u2, u2),
        ),
        ln1_g=jnp.ones((D,), jnp.float32), ln1_b=jnp.zeros((D,), jnp.float32),
        ln2_g=jnp.ones((D,), jnp.float32), ln2_b=jnp.zeros((D,), jnp.float32),
        ln3_g=jnp.ones((D,), jnp.float32), ln3_b=jnp.zeros((D,), jnp.float32),
    )


def cast_weights(params, dtype):
    """Cast 2-D weight matrices (MXU operands) to `dtype`; biases/LN stay f32."""
    return jax.tree_util.tree_map(
        lambda a: a.astype(dtype) if a.ndim == 2 else a, params)


if __name__ == "__main__":
    B, S, S_ENC, D, NUM_HEADS, HIDDEN = 2, 8, 8, 32, 4, 64

    key = jax.random.PRNGKey(0)
    kx, ke, kp = jax.random.split(key, 3)
    x = jax.random.normal(kx, (B, S, D), jnp.float32)
    enc_out = jax.random.normal(ke, (B, S_ENC, D), jnp.float32)
    params = init_params(kp, D, HIDDEN)

    # Resolve the Buffered(1) capability probe eagerly (outside jit tracing).
    _const_spec((8, 128))

    fwd = jax.jit(functools.partial(decoder_layer, num_heads=NUM_HEADS))
    ref = ref_decoder_layer(x, enc_out, params, NUM_HEADS)

    # f32 weights: matches the PyTorch module semantics.
    out_f32 = jax.block_until_ready(fwd(x, enc_out, params))
    assert out_f32.shape == (B, S, D)
    err32 = float(jnp.max(jnp.abs(out_f32 - ref)))
    assert jnp.allclose(out_f32, ref, atol=2e-3, rtol=2e-3), (
        f"f32 max abs err = {err32}")

    # bf16 weights (MXU fast path, f32 accumulation): looser tolerance.
    params_bf16 = cast_weights(params, jnp.bfloat16)
    out_bf16 = jax.block_until_ready(fwd(x, enc_out, params_bf16))
    err16 = float(jnp.max(jnp.abs(out_bf16 - ref)))
    assert jnp.allclose(out_bf16, ref, atol=1e-1, rtol=1e-1), (
        f"bf16 max abs err = {err16}")

    print("KERNEL_OK")
</pallas_src>

<mosaic_0001>
module attributes {stable_mosaic.version = 11 : i64} {
  func.func @ffn_block_kernel(%arg0: i32, %arg1: i32, %arg2: memref<16x32xf32, #tpu.memory_space<vmem>>, %arg3: memref<1x32xf32, #tpu.memory_space<vmem>>, %arg4: memref<1x32xf32, #tpu.memory_space<vmem>>, %arg5: memref<32x64xf32, #tpu.memory_space<vmem>>, %arg6: memref<1x64xf32, #tpu.memory_space<vmem>>, %arg7: memref<64x32xf32, #tpu.memory_space<vmem>>, %arg8: memref<1x32xf32, #tpu.memory_space<vmem>>, %arg9: memref<16x32xf32, #tpu.memory_space<vmem>>, %arg10: memref<16x32xf32, #tpu.memory_space<vmem>>, %arg11: memref<16x32xf32, #tpu.memory_space<vmem>>) attributes {dimension_semantics = [#tpu.dimension_semantics<parallel>, #tpu.dimension_semantics<arbitrary>], iteration_bounds = array<i64: 1, 1>, scalar_prefetch = 0 : i64, scratch_operands = 2 : i64, tpu.core_type = #tpu.core_type<tc>, window_params = [{transform_indices = @transform_0, window_bounds = array<i64: 16, 32>}, {pipeline_mode = #tpu.pipeline_mode<synchronous>, transform_indices = @transform_1, window_bounds = array<i64: 1, 32>}, {pipeline_mode = #tpu.pipeline_mode<synchronous>, transform_indices = @transform_2, window_bounds = array<i64: 1, 32>}, {transform_indices = @transform_3, window_bounds = array<i64: 32, 64>}, {transform_indices = @transform_4, window_bounds = array<i64: 1, 64>}, {transform_indices = @transform_5, window_bounds = array<i64: 64, 32>}, {pipeline_mode = #tpu.pipeline_mode<synchronous>, transform_indices = @transform_6, window_bounds = array<i64: 1, 32>}, {transform_indices = @transform_7, window_bounds = array<i64: 16, 32>}]} {
    %c0_i32 = arith.constant 0 : i32
    %0 = arith.cmpi eq, %arg1, %c0_i32 : i32
    %1 = arith.extui %0 : i1 to i32
    %c0_i32_0 = arith.constant 0 : i32
    %2 = arith.cmpi ne, %1, %c0_i32_0 : i32
    scf.if %2 {
      %c0_18 = arith.constant 0 : index
      %c0_19 = arith.constant 0 : index
      %25 = vector.load %arg2[%c0_18, %c0_19] : memref<16x32xf32, #tpu.memory_space<vmem>>, vector<16x32xf32>
      %c0_20 = arith.constant 0 : index
      %c0_21 = arith.constant 0 : index
      %26 = vector.load %arg3[%c0_20, %c0_21] : memref<1x32xf32, #tpu.memory_space<vmem>>, vector<1x32xf32>
      %c0_22 = arith.constant 0 : index
      %c0_23 = arith.constant 0 : index
      %27 = vector.load %arg4[%c0_22, %c0_23] : memref<1x32xf32, #tpu.memory_space<vmem>>, vector<1x32xf32>
      %cst_24 = arith.constant dense<0.000000e+00> : vector<16xf32>
      %28 = vector.multi_reduction <add>, %25, %cst_24 [1] : vector<16x32xf32> to vector<16xf32>
      %29 = vector.shape_cast %28 : vector<16xf32> to vector<16x1xf32>
      %cst_25 = arith.constant 3.200000e+01 : f32
      %30 = vector.broadcast %cst_25 : f32 to vector<16x1xf32>
      %31 = arith.divf %29, %30 : vector<16x1xf32>
      %32 = vector.broadcast %31 : vector<16x1xf32> to vector<16x32xf32>
      %33 = arith.subf %25, %32 : vector<16x32xf32>
      %34 = arith.mulf %33, %33 : vector<16x32xf32>
      %cst_26 = arith.constant dense<0.000000e+00> : vector<16xf32>
      %35 = vector.multi_reduction <add>, %34, %cst_26 [1] : vector<16x32xf32> to vector<16xf32>
      %36 = vector.shape_cast %35 : vector<16xf32> to vector<16x1xf32>
      %cst_27 = arith.constant 3.200000e+01 : f32
      %37 = vector.broadcast %cst_27 : f32 to vector<16x1xf32>
      %38 = arith.divf %36, %37 : vector<16x1xf32>
      %39 = vector.broadcast %31 : vector<16x1xf32> to vector<16x32xf32>
      %40 = arith.subf %25, %39 : vector<16x32xf32>
      %cst_28 = arith.constant 9.99999974E-6 : f32
      %41 = vector.broadcast %cst_28 : f32 to vector<16x1xf32>
      %42 = arith.addf %38, %41 : vector<16x1xf32>
      %43 = math.rsqrt %42 : vector<16x1xf32>
      %44 = vector.broadcast %43 : vector<16x1xf32> to vector<16x32xf32>
      %45 = arith.mulf %40, %44 : vector<16x32xf32>
      %46 = vector.broadcast %26 : vector<1x32xf32> to vector<16x32xf32>
      %47 = arith.mulf %45, %46 : vector<16x32xf32>
      %48 = vector.broadcast %27 : vector<1x32xf32> to vector<16x32xf32>
      %49 = arith.addf %47, %48 : vector<16x32xf32>
      %c0_29 = arith.constant 0 : index
      %c0_30 = arith.constant 0 : index
      %50 = vector.load %arg10[%c0_29, %c0_30] : memref<16x32xf32, #tpu.memory_space<vmem>>, vector<16x32xf32>
      tpu.vector_store %arg10[%c0_29, %c0_30], %49 {strides = array<i32>} : memref<16x32xf32, #tpu.memory_space<vmem>>, vector<16x32xf32>,
      %cst_31 = arith.constant 0.000000e+00 : f32
      %51 = vector.broadcast %cst_31 : f32 to vector<16x32xf32>
      %c0_32 = arith.constant 0 : index
      %c0_33 = arith.constant 0 : index
      %52 = vector.load %arg11[%c0_32, %c0_33] : memref<16x32xf32, #tpu.memory_space<vmem>>, vector<16x32xf32>
      tpu.vector_store %arg11[%c0_32, %c0_33], %51 {strides = array<i32>} : memref<16x32xf32, #tpu.memory_space<vmem>>, vector<16x32xf32>,
    } else {
    }
    %c0 = arith.constant 0 : index
    %c0_1 = arith.constant 0 : index
    %3 = vector.load %arg10[%c0, %c0_1] : memref<16x32xf32, #tpu.memory_space<vmem>>, vector<16x32xf32>
    %c0_2 = arith.constant 0 : index
    %c0_3 = arith.constant 0 : index
    %4 = vector.load %arg5[%c0_2, %c0_3] : memref<32x64xf32, #tpu.memory_space<vmem>>, vector<32x64xf32>
    %cst = arith.constant dense<0.000000e+00> : vector<16x64xf32>
    %5 = tpu.matmul %3, %4, %cst {dimension_numbers = #tpu.dot_dimension_numbers<[1], [0], [0], [1], [0, 0, 1, 1], [], []>} : vector<16x32xf32>, vector<32x64xf32>, vector<16x64xf32> -> vector<16x64xf32>
    %c0_4 = arith.constant 0 : index
    %c0_5 = arith.constant 0 : index
    %6 = vector.load %arg6[%c0_4, %c0_5] : memref<1x64xf32, #tpu.memory_space<vmem>>, vector<1x64xf32>
    %7 = vector.broadcast %6 : vector<1x64xf32> to vector<16x64xf32>
    %8 = arith.addf %5, %7 : vector<16x64xf32>
    %cst_6 = arith.constant 5.000000e-01 : f32
    %9 = vector.broadcast %cst_6 : f32 to vector<16x64xf32>
    %10 = arith.mulf %9, %8 : vector<16x64xf32>
    %cst_7 = arith.constant 0.707106769 : f32
    %11 = vector.broadcast %cst_7 : f32 to vector<16x64xf32>
    %12 = arith.mulf %8, %11 : vector<16x64xf32>
    %13 = math.erf %12 : vector<16x64xf32>
    %cst_8 = arith.constant 1.000000e+00 : f32
    %14 = vector.broadcast %cst_8 : f32 to vector<16x64xf32>
    %15 = arith.addf %14, %13 : vector<16x64xf32>
    %16 = arith.mulf %10, %15 : vector<16x64xf32>
    %c0_9 = arith.constant 0 : index
    %c0_10 = arith.constant 0 : index
    %17 = vector.load %arg11[%c0_9, %c0_10] : memref<16x32xf32, #tpu.memory_space<vmem>>, vector<16x32xf32>
    %c0_11 = arith.constant 0 : index
    %c0_12 = arith.constant 0 : index
    %18 = vector.load %arg7[%c0_11, %c0_12] : memref<64x32xf32, #tpu.memory_space<vmem>>, vector<64x32xf32>
    %cst_13 = arith.constant dense<0.000000e+00> : vector<16x32xf32>
    %19 = tpu.matmul %16, %18, %cst_13 {dimension_numbers = #tpu.dot_dimension_numbers<[1], [0], [0], [1], [0, 0, 1, 1], [], []>} : vector<16x64xf32>, vector<64x32xf32>, vector<16x32xf32> -> vector<16x32xf32>
    %20 = arith.addf %17, %19 : vector<16x32xf32>
    %c0_14 = arith.constant 0 : index
    %c0_15 = arith.constant 0 : index
    %21 = vector.load %arg11[%c0_14, %c0_15] : memref<16x32xf32, #tpu.memory_space<vmem>>, vector<16x32xf32>
    tpu.vector_store %arg11[%c0_14, %c0_15], %20 {strides = array<i32>} : memref<16x32xf32, #tpu.memory_space<vmem>>, vector<16x32xf32>,
    %c0_i32_16 = arith.constant 0 : i32
    %22 = arith.cmpi eq, %arg1, %c0_i32_16 : i32
    %23 = arith.extui %22 : i1 to i32
    %c0_i32_17 = arith.constant 0 : i32
    %24 = arith.cmpi ne, %23, %c0_i32_17 : i32
    scf.if %24 {
      %c0_18 = arith.constant 0 : index
      %c0_19 = arith.constant 0 : index
      %25 = vector.load %arg2[%c0_18, %c0_19] : memref<16x32xf32, #tpu.memory_space<vmem>>, vector<16x32xf32>
      %c0_20 = arith.constant 0 : index
      %c0_21 = arith.constant 0 : index
      %26 = vector.load %arg11[%c0_20, %c0_21] : memref<16x32xf32, #tpu.memory_space<vmem>>, vector<16x32xf32>
      %27 = arith.addf %25, %26 : vector<16x32xf32>
      %c0_22 = arith.constant 0 : index
      %c0_23 = arith.constant 0 : index
      %28 = vector.load %arg8[%c0_22, %c0_23] : memref<1x32xf32, #tpu.memory_space<vmem>>, vector<1x32xf32>
      %29 = vector.broadcast %28 : vector<1x32xf32> to vector<16x32xf32>
      %30 = arith.addf %27, %29 : vector<16x32xf32>
      %c0_24 = arith.constant 0 : index
      %c0_25 = arith.constant 0 : index
      %31 = vector.load %arg9[%c0_24, %c0_25] : memref<16x32xf32, #tpu.memory_space<vmem>>, vector<16x32xf32>
      tpu.vector_store %arg9[%c0_24, %c0_25], %30 {strides = array<i32>} : memref<16x32xf32, #tpu.memory_space<vmem>>, vector<16x32xf32>,
    } else {
    }
    return
  }
  func.func @transform_0(%arg0: i32, %arg1: i32) -> (i32, i32) {
    %c0_i32 = arith.constant 0 : i32
    %c0_i32_0 = arith.constant 0 : i32
    return %arg0, %c0_i32 : i32, i32
  }
  func.func @transform_1(%arg0: i32, %arg1: i32) -> (i32, i32) {
    %c0_i32 = arith.constant 0 : i32
    %c0_i32_0 = arith.constant 0 : i32
    %c0_i32_1 = arith.constant 0 : i32
    return %c0_i32, %c0_i32_0 : i32, i32
  }
  func.func @transform_2(%arg0: i32, %arg1: i32) -> (i32, i32) {
    %c0_i32 = arith.constant 0 : i32
    %c0_i32_0 = arith.constant 0 : i32
    %c0_i32_1 = arith.constant 0 : i32
    return %c0_i32, %c0_i32_0 : i32, i32
  }
  func.func @transform_3(%arg0: i32, %arg1: i32) -> (i32, i32) {
    %c0_i32 = arith.constant 0 : i32
    %c0_i32_0 = arith.constant 0 : i32
    return %c0_i32, %arg1 : i32, i32
  }
  func.func @transform_4(%arg0: i32, %arg1: i32) -> (i32, i32) {
    %c0_i32 = arith.constant 0 : i32
    %c0_i32_0 = arith.constant 0 : i32
    return %c0_i32, %arg1 : i32, i32
  }
  func.func @transform_5(%arg0: i32, %arg1: i32) -> (i32, i32) {
    %c0_i32 = arith.constant 0 : i32
    %c0_i32_0 = arith.constant 0 : i32
    return %arg1, %c0_i32 : i32, i32
  }
  func.func @transform_6(%arg0: i32, %arg1: i32) -> (i32, i32) {
    %c0_i32 = arith.constant 0 : i32
    %c0_i32_0 = arith.constant 0 : i32
    %c0_i32_1 = arith.constant 0 : i32
    return %c0_i32, %c0_i32_0 : i32, i32
  }
  func.func @transform_7(%arg0: i32, %arg1: i32) -> (i32, i32) {
    %c0_i32 = arith.constant 0 : i32
    %c0_i32_0 = arith.constant 0 : i32
    return %arg0, %c0_i32 : i32, i32
  }
}

module attributes {stable_mosaic.version = 11 : i64} {
  func.func @self_attn_block_kernel(%arg0: i32, %arg1: i32, %arg2: memref<1x8x32xf32, #tpu.memory_space<vmem>>, %arg3: memref<1x32xf32, #tpu.memory_space<vmem>>, %arg4: memref<1x32xf32, #tpu.memory_space<vmem>>, %arg5: memref<32x32xf32, #tpu.memory_space<vmem>>, %arg6: memref<1x32xf32, #tpu.memory_space<vmem>>, %arg7: memref<32x32xf32, #tpu.memory_space<vmem>>, %arg8: memref<1x32xf32, #tpu.memory_space<vmem>>, %arg9: memref<32x32xf32, #tpu.memory_space<vmem>>, %arg10: memref<1x32xf32, #tpu.memory_space<vmem>>, %arg11: memref<32x32xf32, #tpu.memory_space<vmem>>, %arg12: memref<1x32xf32, #tpu.memory_space<vmem>>, %arg13: memref<1x8x32xf32, #tpu.memory_space<vmem>>, %arg14: memref<8x32xf32, #tpu.memory_space<vmem>>, %arg15: memref<8x32xf32, #tpu.memory_space<vmem>>, %arg16: memref<8x32xf32, #tpu.memory_space<vmem>>) attributes {dimension_semantics = [#tpu.dimension_semantics<parallel>, #tpu.dimension_semantics<arbitrary>], iteration_bounds = array<i64: 2, 1>, scalar_prefetch = 0 : i64, scratch_operands = 3 : i64, tpu.core_type = #tpu.core_type<tc>, window_params = [{transform_indices = @transform_0, window_bounds = array<i64: 1, 8, 32>}, {pipeline_mode = #tpu.pipeline_mode<synchronous>, transform_indices = @transform_1, window_bounds = array<i64: 1, 32>}, {pipeline_mode = #tpu.pipeline_mode<synchronous>, transform_indices = @transform_2, window_bounds = array<i64: 1, 32>}, {pipeline_mode = #tpu.pipeline_mode<synchronous>, transform_indices = @transform_3, window_bounds = array<i64: 32, 32>}, {pipeline_mode = #tpu.pipeline_mode<synchronous>, transform_indices = @transform_4, window_bounds = array<i64: 1, 32>}, {pipeline_mode = #tpu.pipeline_mode<synchronous>, transform_indices = @transform_5, window_bounds = array<i64: 32, 32>}, {pipeline_mode = #tpu.pipeline_mode<synchronous>, transform_indices = @transform_6, window_bounds = array<i64: 1, 32>}, {pipeline_mode = #tpu.pipeline_mode<synchronous>, transform_indices = @transform_7, window_bounds = array<i64: 32, 32>}, {pipeline_mode = #tpu.pipeline_mode<synchronous>, transform_indices = @transform_8, window_bounds = array<i64: 1, 32>}, {pipeline_mode = #tpu.pipeline_mode<synchronous>, transform_indices = @transform_9, window_bounds = array<i64: 32, 32>}, {pipeline_mode = #tpu.pipeline_mode<synchronous>, transform_indices = @transform_10, window_bounds = array<i64: 1, 32>}, {transform_indices = @transform_11, window_bounds = array<i64: 1, 8, 32>}]} {
    %c0_i32 = arith.constant 0 : i32
    %0 = arith.cmpi eq, %arg1, %c0_i32 : i32
    %1 = arith.extui %0 : i1 to i32
    %c0_i32_0 = arith.constant 0 : i32
    %2 = arith.cmpi ne, %1, %c0_i32_0 : i32
    scf.if %2 {
      %c0_67 = arith.constant 0 : index
      %c0_68 = arith.constant 0 : index
      %c0_69 = arith.constant 0 : index
      %129 = vector.load %arg2[%c0_67, %c0_68, %c0_69] : memref<1x8x32xf32, #tpu.memory_space<vmem>>, vector<1x8x32xf32>
      %130 = vector.shape_cast %129 : vector<1x8x32xf32> to vector<8x32xf32>
      %c0_70 = arith.constant 0 : index
      %c0_71 = arith.constant 0 : index
      %131 = vector.load %arg3[%c0_70, %c0_71] : memref<1x32xf32, #tpu.memory_space<vmem>>, vector<1x32xf32>
      %c0_72 = arith.constant 0 : index
      %c0_73 = arith.constant 0 : index
      %132 = vector.load %arg4[%c0_72, %c0_73] : memref<1x32xf32, #tpu.memory_space<vmem>>, vector<1x32xf32>
      %cst_74 = arith.constant dense<0.000000e+00> : vector<8xf32>
      %133 = vector.multi_reduction <add>, %130, %cst_74 [1] : vector<8x32xf32> to vector<8xf32>
      %134 = vector.shape_cast %133 : vector<8xf32> to vector<8x1xf32>
      %cst_75 = arith.constant 3.200000e+01 : f32
      %135 = vector.broadcast %cst_75 : f32 to vector<8x1xf32>
      %136 = arith.divf %134, %135 : vector<8x1xf32>
      %137 = vector.broadcast %136 : vector<8x1xf32> to vector<8x32xf32>
      %138 = arith.subf %130, %137 : vector<8x32xf32>
      %139 = arith.mulf %138, %138 : vector<8x32xf32>
      %cst_76 = arith.constant dense<0.000000e+00> : vector<8xf32>
      %140 = vector.multi_reduction <add>, %139, %cst_76 [1] : vector<8x32xf32> to vector<8xf32>
      %141 = vector.shape_cast %140 : vector<8xf32> to vector<8x1xf32>
      %cst_77 = arith.constant 3.200000e+01 : f32
      %142 = vector.broadcast %cst_77 : f32 to vector<8x1xf32>
      %143 = arith.divf %141, %142 : vector<8x1xf32>
      %144 = vector.broadcast %136 : vector<8x1xf32> to vector<8x32xf32>
      %145 = arith.subf %130, %144 : vector<8x32xf32>
      %cst_78 = arith.constant 9.99999974E-6 : f32
      %146 = vector.broadcast %cst_78 : f32 to vector<8x1xf32>
      %147 = arith.addf %143, %146 : vector<8x1xf32>
      %148 = math.rsqrt %147 : vector<8x1xf32>
      %149 = vector.broadcast %148 : vector<8x1xf32> to vector<8x32xf32>
      %150 = arith.mulf %145, %149 : vector<8x32xf32>
      %151 = vector.broadcast %131 : vector<1x32xf32> to vector<8x32xf32>
      %152 = arith.mulf %150, %151 : vector<8x32xf32>
      %153 = vector.broadcast %132 : vector<1x32xf32> to vector<8x32xf32>
      %154 = arith.addf %152, %153 : vector<8x32xf32>
      %c0_79 = arith.constant 0 : index
      %c0_80 = arith.constant 0 : index
      %155 = vector.load %arg7[%c0_79, %c0_80] : memref<32x32xf32, #tpu.memory_space<vmem>>, vector<32x32xf32>
      %cst_81 = arith.constant dense<0.000000e+00> : vector<8x32xf32>
      %156 = tpu.matmul %154, %155, %cst_81 {dimension_numbers = #tpu.dot_dimension_numbers<[1], [0], [0], [1], [0, 0, 1, 1], [], []>} : vector<8x32xf32>, vector<32x32xf32>, vector<8x32xf32> -> vector<8x32xf32>
      %c0_82 = arith.constant 0 : index
      %c0_83 = arith.constant 0 : index
      %157 = vector.load %arg8[%c0_82, %c0_83] : memref<1x32xf32, #tpu.memory_space<vmem>>, vector<1x32xf32>
      %158 = vector.broadcast %157 : vector<1x32xf32> to vector<8x32xf32>
      %159 = arith.addf %156, %158 : vector<8x32xf32>
      %c0_84 = arith.constant 0 : index
      %c0_85 = arith.constant 0 : index
      %160 = vector.load %arg14[%c0_84, %c0_85] : memref<8x32xf32, #tpu.memory_space<vmem>>, vector<8x32xf32>
      tpu.vector_store %arg14[%c0_84, %c0_85], %159 {strides = array<i32>} : memref<8x32xf32, #tpu.memory_space<vmem>>, vector<8x32xf32>,
      %c0_86 = arith.constant 0 : index
      %c0_87 = arith.constant 0 : index
      %161 = vector.load %arg9[%c0_86, %c0_87] : memref<32x32xf32, #tpu.memory_space<vmem>>, vector<32x32xf32>
      %cst_88 = arith.constant dense<0.000000e+00> : vector<8x32xf32>
      %162 = tpu.matmul %154, %161, %cst_88 {dimension_numbers = #tpu.dot_dimension_numbers<[1], [0], [0], [1], [0, 0, 1, 1], [], []>} : vector<8x32xf32>, vector<32x32xf32>, vector<8x32xf32> -> vector<8x32xf32>
      %c0_89 = arith.constant 0 : index
      %c0_90 = arith.constant 0 : index
      %163 = vector.load %arg10[%c0_89, %c0_90] : memref<1x32xf32, #tpu.memory_space<vmem>>, vector<1x32xf32>
      %164 = vector.broadcast %163 : vector<1x32xf32> to vector<8x32xf32>
      %165 = arith.addf %162, %164 : vector<8x32xf32>
      %c0_91 = arith.constant 0 : index
      %c0_92 = arith.constant 0 : index
      %166 = vector.load %arg15[%c0_91, %c0_92] : memref<8x32xf32, #tpu.memory_space<vmem>>, vector<8x32xf32>
      tpu.vector_store %arg15[%c0_91, %c0_92], %165 {strides = array<i32>} : memref<8x32xf32, #tpu.memory_space<vmem>>, vector<8x32xf32>,
    } else {
    }
    %c8_i32 = arith.constant 8 : i32
    %3 = arith.muli %arg1, %c8_i32 : i32
    %4 = tpu.assume_multiple %3, 8 : i32
    %c0 = arith.constant 0 : index
    %5 = arith.index_cast %4 : i32 to index
    %c0_1 = arith.constant 0 : index
    %6 = vector.load %arg2[%c0, %5, %c0_1] : memref<1x8x32xf32, #tpu.memory_space<vmem>>, vector<1x8x32xf32>
    %7 = vector.shape_cast %6 : vector<1x8x32xf32> to vector<8x32xf32>
    %c0_2 = arith.constant 0 : index
    %c0_3 = arith.constant 0 : index
    %8 = vector.load %arg3[%c0_2, %c0_3] : memref<1x32xf32, #tpu.memory_space<vmem>>, vector<1x32xf32>
    %c0_4 = arith.constant 0 : index
    %c0_5 = arith.constant 0 : index
    %9 = vector.load %arg4[%c0_4, %c0_5] : memref<1x32xf32, #tpu.memory_space<vmem>>, vector<1x32xf32>
    %cst = arith.constant dense<0.000000e+00> : vector<8xf32>
    %10 = vector.multi_reduction <add>, %7, %cst [1] : vector<8x32xf32> to vector<8xf32>
    %11 = vector.shape_cast %10 : vector<8xf32> to vector<8x1xf32>
    %cst_6 = arith.constant 3.200000e+01 : f32
    %12 = vector.broadcast %cst_6 : f32 to vector<8x1xf32>
    %13 = arith.divf %11, %12 : vector<8x1xf32>
    %14 = vector.broadcast %13 : vector<8x1xf32> to vector<8x32xf32>
    %15 = arith.subf %7, %14 : vector<8x32xf32>
    %16 = arith.mulf %15, %15 : vector<8x32xf32>
    %cst_7 = arith.constant dense<0.000000e+00> : vector<8xf32>
    %17 = vector.multi_reduction <add>, %16, %cst_7 [1] : vector<8x32xf32> to vector<8xf32>
    %18 = vector.shape_cast %17 : vector<8xf32> to vector<8x1xf32>
    %cst_8 = arith.constant 3.200000e+01 : f32
    %19 = vector.broadcast %cst_8 : f32 to vector<8x1xf32>
    %20 = arith.divf %18, %19 : vector<8x1xf32>
    %21 = vector.broadcast %13 : vector<8x1xf32> to vector<8x32xf32>
    %22 = arith.subf %7, %21 : vector<8x32xf32>
    %cst_9 = arith.constant 9.99999974E-6 : f32
    %23 = vector.broadcast %cst_9 : f32 to vector<8x1xf32>
    %24 = arith.addf %20, %23 : vector<8x1xf32>
    %25 = math.rsqrt %24 : vector<8x1xf32>
    %26 = vector.broadcast %25 : vector<8x1xf32> to vector<8x32xf32>
    %27 = arith.mulf %22, %26 : vector<8x32xf32>
    %28 = vector.broadcast %8 : vector<1x32xf32> to vector<8x32xf32>
    %29 = arith.mulf %27, %28 : vector<8x32xf32>
    %30 = vector.broadcast %9 : vector<1x32xf32> to vector<8x32xf32>
    %31 = arith.addf %29, %30 : vector<8x32xf32>
    %c0_10 = arith.constant 0 : index
    %c0_11 = arith.constant 0 : index
    %32 = vector.load %arg5[%c0_10, %c0_11] : memref<32x32xf32, #tpu.memory_space<vmem>>, vector<32x32xf32>
    %cst_12 = arith.constant dense<0.000000e+00> : vector<8x32xf32>
    %33 = tpu.matmul %31, %32, %cst_12 {dimension_numbers = #tpu.dot_dimension_numbers<[1], [0], [0], [1], [0, 0, 1, 1], [], []>} : vector<8x32xf32>, vector<32x32xf32>, vector<8x32xf32> -> vector<8x32xf32>
    %c0_13 = arith.constant 0 : index
    %c0_14 = arith.constant 0 : index
    %34 = vector.load %arg6[%c0_13, %c0_14] : memref<1x32xf32, #tpu.memory_space<vmem>>, vector<1x32xf32>
    %35 = vector.broadcast %34 : vector<1x32xf32> to vector<8x32xf32>
    %36 = arith.addf %33, %35 : vector<8x32xf32>
    %cst_15 = arith.constant 0.353553385 : f32
    %37 = vector.broadcast %cst_15 : f32 to vector<8x32xf32>
    %38 = arith.mulf %36, %37 : vector<8x32xf32>
    %39 = vector.extract_strided_slice %38 {offsets = [0, 0], sizes = [8, 8], strides = [1, 1]} : vector<8x32xf32> to vector<8x8xf32>
    %c0_16 = arith.constant 0 : index
    %c0_17 = arith.constant 0 : index
    %40 = vector.load %arg14[%c0_16, %c0_17] : memref<8x32xf32, #tpu.memory_space<vmem>>, vector<8x8xf32>
    %cst_18 = arith.constant dense<0.000000e+00> : vector<8x8xf32>
    %41 = tpu.matmul %39, %40, %cst_18 {dimension_numbers = #tpu.dot_dimension_numbers<[1], [1], [0], [0], [0, 0, 1, 0], [], []>} : vector<8x8xf32>, vector<8x8xf32>, vector<8x8xf32> -> vector<8x8xf32>
    %cst_19 = arith.constant dense<0xFF800000> : vector<8xf32>
    %42 = vector.multi_reduction <maximumf>, %41, %cst_19 [1] : vector<8x8xf32> to vector<8xf32>
    %43 = vector.shape_cast %42 : vector<8xf32> to vector<8x1xf32>
    %44 = vector.broadcast %43 : vector<8x1xf32> to vector<8x8xf32>
    %45 = arith.subf %41, %44 : vector<8x8xf32>
    %46 = math.exp %45 : vector<8x8xf32>
    %cst_20 = arith.constant dense<0.000000e+00> : vector<8xf32>
    %47 = vector.multi_reduction <add>, %46, %cst_20 [1] : vector<8x8xf32> to vector<8xf32>
    %48 = vector.shape_cast %47 : vector<8xf32> to vector<8x1xf32>
    %49 = tpu.reciprocal %48 {approx = true} : vector<8x1xf32> -> vector<8x1xf32>
    %50 = arith.mulf %48, %49 : vector<8x1xf32>
    %cst_21 = arith.constant 2.000000e+00 : f32
    %51 = vector.broadcast %cst_21 : f32 to vector<8x1xf32>
    %52 = arith.subf %51, %50 : vector<8x1xf32>
    %53 = arith.mulf %49, %52 : vector<8x1xf32>
    %54 = vector.broadcast %53 : vector<8x1xf32> to vector<8x8xf32>
    %55 = arith.mulf %46, %54 : vector<8x8xf32>
    %c0_22 = arith.constant 0 : index
    %c0_23 = arith.constant 0 : index
    %56 = vector.load %arg15[%c0_22, %c0_23] : memref<8x32xf32, #tpu.memory_space<vmem>>, vector<8x8xf32>
    %cst_24 = arith.constant dense<0.000000e+00> : vector<8x8xf32>
    %57 = tpu.matmul %55, %56, %cst_24 {dimension_numbers = #tpu.dot_dimension_numbers<[1], [0], [0], [1], [0, 0, 1, 1], [], []>} : vector<8x8xf32>, vector<8x8xf32>, vector<8x8xf32> -> vector<8x8xf32>
    %c0_25 = arith.constant 0 : index
    %c0_26 = arith.constant 0 : index
    %58 = vector.load %arg16[%c0_25, %c0_26] : memref<8x32xf32, #tpu.memory_space<vmem>>, vector<8x8xf32>
    tpu.vector_store %arg16[%c0_25, %c0_26], %57 {strides = array<i32>} : memref<8x32xf32, #tpu.memory_space<vmem>>, vector<8x8xf32>,
    %59 = vector.extract_strided_slice %38 {offsets = [0, 8], sizes = [8, 8], strides = [1, 1]} : vector<8x32xf32> to vector<8x8xf32>
    %c0_27 = arith.constant 0 : index
    %c8 = arith.constant 8 : index
    %60 = vector.load %arg14[%c0_27, %c8] : memref<8x32xf32, #tpu.memory_space<vmem>>, vector<8x8xf32>
    %cst_28 = arith.constant dense<0.000000e+00> : vector<8x8xf32>
    %61 = tpu.matmul %59, %60, %cst_28 {dimension_numbers = #tpu.dot_dimension_numbers<[1], [1], [0], [0], [0, 0, 1, 0], [], []>} : vector<8x8xf32>, vector<8x8xf32>, vector<8x8xf32> -> vector<8x8xf32>
    %cst_29 = arith.constant dense<0xFF800000> : vector<8xf32>
    %62 = vector.multi_reduction <maximumf>, %61, %cst_29 [1] : vector<8x8xf32> to vector<8xf32>
    %63 = vector.shape_cast %62 : vector<8xf32> to vector<8x1xf32>
    %64 = vector.broadcast %63 : vector<8x1xf32> to vector<8x8xf32>
    %65 = arith.subf %61, %64 : vector<8x8xf32>
    %66 = math.exp %65 : vector<8x8xf32>
    %cst_30 = arith.constant dense<0.000000e+00> : vector<8xf32>
    %67 = vector.multi_reduction <add>, %66, %cst_30 [1] : vector<8x8xf32> to vector<8xf32>
    %68 = vector.shape_cast %67 : vector<8xf32> to vector<8x1xf32>
    %69 = tpu.reciprocal %68 {approx = true} : vector<8x1xf32> -> vector<8x1xf32>
    %70 = arith.mulf %68, %69 : vector<8x1xf32>
    %cst_31 = arith.constant 2.000000e+00 : f32
    %71 = vector.broadcast %cst_31 : f32 to vector<8x1xf32>
    %72 = arith.subf %71, %70 : vector<8x1xf32>
    %73 = arith.mulf %69, %72 : vector<8x1xf32>
    %74 = vector.broadcast %73 : vector<8x1xf32> to vector<8x8xf32>
    %75 = arith.mulf %66, %74 : vector<8x8xf32>
    %c0_32 = arith.constant 0 : index
    %c8_33 = arith.constant 8 : index
    %76 = vector.load %arg15[%c0_32, %c8_33] : memref<8x32xf32, #tpu.memory_space<vmem>>, vector<8x8xf32>
    %cst_34 = arith.constant dense<0.000000e+00> : vector<8x8xf32>
    %77 = tpu.matmul %75, %76, %cst_34 {dimension_numbers = #tpu.dot_dimension_numbers<[1], [0], [0], [1], [0, 0, 1, 1], [], []>} : vector<8x8xf32>, vector<8x8xf32>, vector<8x8xf32> -> vector<8x8xf32>
    %c0_35 = arith.constant 0 : index
    %c8_36 = arith.constant 8 : index
    %78 = vector.load %arg16[%c0_35, %c8_36] : memref<8x32xf32, #tpu.memory_space<vmem>>, vector<8x8xf32>
    tpu.vector_store %arg16[%c0_35, %c8_36], %77 {strides = array<i32>} : memref<8x32xf32, #tpu.memory_space<vmem>>, vector<8x8xf32>,
    %79 = vector.extract_strided_slice %38 {offsets = [0, 16], sizes = [8, 8], strides = [1, 1]} : vector<8x32xf32> to vector<8x8xf32>
    %c0_37 = arith.constant 0 : index
    %c16 = arith.constant 16 : index
    %80 = vector.load %arg14[%c0_37, %c16] : memref<8x32xf32, #tpu.memory_space<vmem>>, vector<8x8xf32>
    %cst_38 = arith.constant dense<0.000000e+00> : vector<8x8xf32>
    %81 = tpu.matmul %79, %80, %cst_38 {dimension_numbers = #tpu.dot_dimension_numbers<[1], [1], [0], [0], [0, 0, 1, 0], [], []>} : vector<8x8xf32>, vector<8x8xf32>, vector<8x8xf32> -> vector<8x8xf32>
    %cst_39 = arith.constant dense<0xFF800000> : vector<8xf32>
    %82 = vector.multi_reduction <maximumf>, %81, %cst_39 [1] : vector<8x8xf32> to vector<8xf32>
    %83 = vector.shape_cast %82 : vector<8xf32> to vector<8x1xf32>
    %84 = vector.broadcast %83 : vector<8x1xf32> to vector<8x8xf32>
    %85 = arith.subf %81, %84 : vector<8x8xf32>
    %86 = math.exp %85 : vector<8x8xf32>
    %cst_40 = arith.constant dense<0.000000e+00> : vector<8xf32>
    %87 = vector.multi_reduction <add>, %86, %cst_40 [1] : vector<8x8xf32> to vector<8xf32>
    %88 = vector.shape_cast %87 : vector<8xf32> to vector<8x1xf32>
    %89 = tpu.reciprocal %88 {approx = true} : vector<8x1xf32> -> vector<8x1xf32>
    %90 = arith.mulf %88, %89 : vector<8x1xf32>
    %cst_41 = arith.constant 2.000000e+00 : f32
    %91 = vector.broadcast %cst_41 : f32 to vector<8x1xf32>
    %92 = arith.subf %91, %90 : vector<8x1xf32>
    %93 = arith.mulf %89, %92 : vector<8x1xf32>
    %94 = vector.broadcast %93 : vector<8x1xf32> to vector<8x8xf32>
    %95 = arith.mulf %86, %94 : vector<8x8xf32>
    %c0_42 = arith.constant 0 : index
    %c16_43 = arith.constant 16 : index
    %96 = vector.load %arg15[%c0_42, %c16_43] : memref<8x32xf32, #tpu.memory_space<vmem>>, vector<8x8xf32>
    %cst_44 = arith.constant dense<0.000000e+00> : vector<8x8xf32>
    %97 = tpu.matmul %95, %96, %cst_44 {dimension_numbers = #tpu.dot_dimension_numbers<[1], [0], [0], [1], [0, 0, 1, 1], [], []>} : vector<8x8xf32>, vector<8x8xf32>, vector<8x8xf32> -> vector<8x8xf32>
    %c0_45 = arith.constant 0 : index
    %c16_46 = arith.constant 16 : index
    %98 = vector.load %arg16[%c0_45, %c16_46] : memref<8x32xf32, #tpu.memory_space<vmem>>, vector<8x8xf32>
    tpu.vector_store %arg16[%c0_45, %c16_46], %97 {strides = array<i32>} : memref<8x32xf32, #tpu.memory_space<vmem>>, vector<8x8xf32>,
    %99 = vector.extract_strided_slice %38 {offsets = [0, 24], sizes = [8, 8], strides = [1, 1]} : vector<8x32xf32> to vector<8x8xf32>
    %c0_47 = arith.constant 0 : index
    %c24 = arith.constant 24 : index
    %100 = vector.load %arg14[%c0_47, %c24] : memref<8x32xf32, #tpu.memory_space<vmem>>, vector<8x8xf32>
    %cst_48 = arith.constant dense<0.000000e+00> : vector<8x8xf32>
    %101 = tpu.matmul %99, %100, %cst_48 {dimension_numbers = #tpu.dot_dimension_numbers<[1], [1], [0], [0], [0, 0, 1, 0], [], []>} : vector<8x8xf32>, vector<8x8xf32>, vector<8x8xf32> -> vector<8x8xf32>
    %cst_49 = arith.constant dense<0xFF800000> : vector<8xf32>
    %102 = vector.multi_reduction <maximumf>, %101, %cst_49 [1] : vector<8x8xf32> to vector<8xf32>
    %103 = vector.shape_cast %102 : vector<8xf32> to vector<8x1xf32>
    %104 = vector.broadcast %103 : vector<8x1xf32> to vector<8x8xf32>
    %105 = arith.subf %101, %104 : vector<8x8xf32>
    %106 = math.exp %105 : vector<8x8xf32>
    %cst_50 = arith.constant dense<0.000000e+00> : vector<8xf32>
    %107 = vector.multi_reduction <add>, %106, %cst_50 [1] : vector<8x8xf32> to vector<8xf32>
    %108 = vector.shape_cast %107 : vector<8xf32> to vector<8x1xf32>
    %109 = tpu.reciprocal %108 {approx = true} : vector<8x1xf32> -> vector<8x1xf32>
    %110 = arith.mulf %108, %109 : vector<8x1xf32>
    %cst_51 = arith.constant 2.000000e+00 : f32
    %111 = vector.broadcast %cst_51 : f32 to vector<8x1xf32>
    %112 = arith.subf %111, %110 : vector<8x1xf32>
    %113 = arith.mulf %109, %112 : vector<8x1xf32>
    %114 = vector.broadcast %113 : vector<8x1xf32> to vector<8x8xf32>
    %115 = arith.mulf %106, %114 : vector<8x8xf32>
    %c0_52 = arith.constant 0 : index
    %c24_53 = arith.constant 24 : index
    %116 = vector.load %arg15[%c0_52, %c24_53] : memref<8x32xf32, #tpu.memory_space<vmem>>, vector<8x8xf32>
    %cst_54 = arith.constant dense<0.000000e+00> : vector<8x8xf32>
    %117 = tpu.matmul %115, %116, %cst_54 {dimension_numbers = #tpu.dot_dimension_numbers<[1], [0], [0], [1], [0, 0, 1, 1], [], []>} : vector<8x8xf32>, vector<8x8xf32>, vector<8x8xf32> -> vector<8x8xf32>
    %c0_55 = arith.constant 0 : index
    %c24_56 = arith.constant 24 : index
    %118 = vector.load %arg16[%c0_55, %c24_56] : memref<8x32xf32, #tpu.memory_space<vmem>>, vector<8x8xf32>
    tpu.vector_store %arg16[%c0_55, %c24_56], %117 {strides = array<i32>} : memref<8x32xf32, #tpu.memory_space<vmem>>, vector<8x8xf32>,
    %c0_57 = arith.constant 0 : index
    %c0_58 = arith.constant 0 : index
    %119 = vector.load %arg16[%c0_57, %c0_58] : memref<8x32xf32, #tpu.memory_space<vmem>>, vector<8x32xf32>
    %c0_59 = arith.constant 0 : index
    %c0_60 = arith.constant 0 : index
    %120 = vector.load %arg11[%c0_59, %c0_60] : memref<32x32xf32, #tpu.memory_space<vmem>>, vector<32x32xf32>
    %cst_61 = arith.constant dense<0.000000e+00> : vector<8x32xf32>
    %121 = tpu.matmul %119, %120, %cst_61 {dimension_numbers = #tpu.dot_dimension_numbers<[1], [0], [0], [1], [0, 0, 1, 1], [], []>} : vector<8x32xf32>, vector<32x32xf32>, vector<8x32xf32> -> vector<8x32xf32>
    %c0_62 = arith.constant 0 : index
    %c0_63 = arith.constant 0 : index
    %122 = vector.load %arg12[%c0_62, %c0_63] : memref<1x32xf32, #tpu.memory_space<vmem>>, vector<1x32xf32>
    %123 = vector.broadcast %122 : vector<1x32xf32> to vector<8x32xf32>
    %124 = arith.addf %121, %123 : vector<8x32xf32>
    %125 = arith.addf %7, %124 : vector<8x32xf32>
    %c0_64 = arith.constant 0 : index
    %c0_65 = arith.constant 0 : index
    %c0_66 = arith.constant 0 : index
    %126 = vector.load %arg13[%c0_64, %c0_65, %c0_66] : memref<1x8x32xf32, #tpu.memory_space<vmem>>, vector<1x8x32xf32>
    %127 = vector.shape_cast %126 : vector<1x8x32xf32> to vector<8x32xf32>
    %128 = vector.shape_cast %125 : vector<8x32xf32> to vector<1x8x32xf32>
    tpu.vector_store %arg13[%c0_64, %c0_65, %c0_66], %128 {strides = array<i32>} : memref<1x8x32xf32, #tpu.memory_space<vmem>>, vector<1x8x32xf32>,
    return
  }
  func.func @transform_0(%arg0: i32, %arg1: i32) -> (i32, i32, i32) {
    %c0_i32 = arith.constant 0 : i32
    %c0_i32_0 = arith.constant 0 : i32
    %c0_i32_1 = arith.constant 0 : i32
    return %arg0, %c0_i32, %c0_i32_0 : i32, i32, i32
  }
  func.func @transform_1(%arg0: i32, %arg1: i32) -> (i32, i32) {
    %c0_i32 = arith.constant 0 : i32
    %c0_i32_0 = arith.constant 0 : i32
    %c0_i32_1 = arith.constant 0 : i32
    return %c0_i32, %c0_i32_0 : i32, i32
  }
  func.func @transform_2(%arg0: i32, %arg1: i32) -> (i32, i32) {
    %c0_i32 = arith.constant 0 : i32
    %c0_i32_0 = arith.constant 0 : i32
    %c0_i32_1 = arith.constant 0 : i32
    return %c0_i32, %c0_i32_0 : i32, i32
  }
  func.func @transform_3(%arg0: i32, %arg1: i32) -> (i32, i32) {
    %c0_i32 = arith.constant 0 : i32
    %c0_i32_0 = arith.constant 0 : i32
    %c0_i32_1 = arith.constant 0 : i32
    return %c0_i32, %c0_i32_0 : i32, i32
  }
  func.func @transform_4(%arg0: i32, %arg1: i32) -> (i32, i32) {
    %c0_i32 = arith.constant 0 : i32
    %c0_i32_0 = arith.constant 0 : i32
    %c0_i32_1 = arith.constant 0 : i32
    return %c0_i32, %c0_i32_0 : i32, i32
  }
  func.func @transform_5(%arg0: i32, %arg1: i32) -> (i32, i32) {
    %c0_i32 = arith.constant 0 : i32
    %c0_i32_0 = arith.constant 0 : i32
    %c0_i32_1 = arith.constant 0 : i32
    return %c0_i32, %c0_i32_0 : i32, i32
  }
  func.func @transform_6(%arg0: i32, %arg1: i32) -> (i32, i32) {
    %c0_i32 = arith.constant 0 : i32
    %c0_i32_0 = arith.constant 0 : i32
    %c0_i32_1 = arith.constant 0 : i32
    return %c0_i32, %c0_i32_0 : i32, i32
  }
  func.func @transform_7(%arg0: i32, %arg1: i32) -> (i32, i32) {
    %c0_i32 = arith.constant 0 : i32
    %c0_i32_0 = arith.constant 0 : i32
    %c0_i32_1 = arith.constant 0 : i32
    return %c0_i32, %c0_i32_0 : i32, i32
  }
  func.func @transform_8(%arg0: i32, %arg1: i32) -> (i32, i32) {
    %c0_i32 = arith.constant 0 : i32
    %c0_i32_0 = arith.constant 0 : i32
    %c0_i32_1 = arith.constant 0 : i32
    return %c0_i32, %c0_i32_0 : i32, i32
  }
  func.func @transform_9(%arg0: i32, %arg1: i32) -> (i32, i32) {
    %c0_i32 = arith.constant 0 : i32
    %c0_i32_0 = arith.constant 0 : i32
    %c0_i32_1 = arith.constant 0 : i32
    return %c0_i32, %c0_i32_0 : i32, i32
  }
  func.func @transform_10(%arg0: i32, %arg1: i32) -> (i32, i32) {
    %c0_i32 = arith.constant 0 : i32
    %c0_i32_0 = arith.constant 0 : i32
    %c0_i32_1 = arith.constant 0 : i32
    return %c0_i32, %c0_i32_0 : i32, i32
  }
  func.func @transform_11(%arg0: i32, %arg1: i32) -> (i32, i32, i32) {
    %c0_i32 = arith.constant 0 : i32
    %c0_i32_0 = arith.constant 0 : i32
    return %arg0, %arg1, %c0_i32 : i32, i32, i32
  }
}

module attributes {stable_mosaic.version = 11 : i64} {
  func.func @cross_attn_block_kernel(%arg0: i32, %arg1: i32, %arg2: memref<1x8x32xf32, #tpu.memory_space<vmem>>, %arg3: memref<1x8x32xf32, #tpu.memory_space<vmem>>, %arg4: memref<1x32xf32, #tpu.memory_space<vmem>>, %arg5: memref<1x32xf32, #tpu.memory_space<vmem>>, %arg6: memref<32x32xf32, #tpu.memory_space<vmem>>, %arg7: memref<1x32xf32, #tpu.memory_space<vmem>>, %arg8: memref<32x32xf32, #tpu.memory_space<vmem>>, %arg9: memref<1x32xf32, #tpu.memory_space<vmem>>, %arg10: memref<32x32xf32, #tpu.memory_space<vmem>>, %arg11: memref<1x32xf32, #tpu.memory_space<vmem>>, %arg12: memref<32x32xf32, #tpu.memory_space<vmem>>, %arg13: memref<1x32xf32, #tpu.memory_space<vmem>>, %arg14: memref<1x8x32xf32, #tpu.memory_space<vmem>>, %arg15: memref<8x32xf32, #tpu.memory_space<vmem>>, %arg16: memref<8x32xf32, #tpu.memory_space<vmem>>, %arg17: memref<8x32xf32, #tpu.memory_space<vmem>>) attributes {dimension_semantics = [#tpu.dimension_semantics<parallel>, #tpu.dimension_semantics<arbitrary>], iteration_bounds = array<i64: 2, 1>, scalar_prefetch = 0 : i64, scratch_operands = 3 : i64, tpu.core_type = #tpu.core_type<tc>, window_params = [{transform_indices = @transform_0, window_bounds = array<i64: 1, 8, 32>}, {transform_indices = @transform_1, window_bounds = array<i64: 1, 8, 32>}, {pipeline_mode = #tpu.pipeline_mode<synchronous>, transform_indices = @transform_2, window_bounds = array<i64: 1, 32>}, {pipeline_mode = #tpu.pipeline_mode<synchronous>, transform_indices = @transform_3, window_bounds = array<i64: 1, 32>}, {pipeline_mode = #tpu.pipeline_mode<synchronous>, transform_indices = @transform_4, window_bounds = array<i64: 32, 32>}, {pipeline_mode = #tpu.pipeline_mode<synchronous>, transform_indices = @transform_5, window_bounds = array<i64: 1, 32>}, {pipeline_mode = #tpu.pipeline_mode<synchronous>, transform_indices = @transform_6, window_bounds = array<i64: 32, 32>}, {pipeline_mode = #tpu.pipeline_mode<synchronous>, transform_indices = @transform_7, window_bounds = array<i64: 1, 32>}, {pipeline_mode = #tpu.pipeline_mode<synchronous>, transform_indices = @transform_8, window_bounds = array<i64: 32, 32>}, {pipeline_mode = #tpu.pipeline_mode<synchronous>, transform_indices = @transform_9, window_bounds = array<i64: 1, 32>}, {pipeline_mode = #tpu.pipeline_mode<synchronous>, transform_indices = @transform_10, window_bounds = array<i64: 32, 32>}, {pipeline_mode = #tpu.pipeline_mode<synchronous>, transform_indices = @transform_11, window_bounds = array<i64: 1, 32>}, {transform_indices = @transform_12, window_bounds = array<i64: 1, 8, 32>}]} {
    %c0_i32 = arith.constant 0 : i32
    %0 = arith.cmpi eq, %arg1, %c0_i32 : i32
    %1 = arith.extui %0 : i1 to i32
    %c0_i32_0 = arith.constant 0 : i32
    %2 = arith.cmpi ne, %1, %c0_i32_0 : i32
    scf.if %2 {
      %c0_67 = arith.constant 0 : index
      %c0_68 = arith.constant 0 : index
      %c0_69 = arith.constant 0 : index
      %129 = vector.load %arg3[%c0_67, %c0_68, %c0_69] : memref<1x8x32xf32, #tpu.memory_space<vmem>>, vector<1x8x32xf32>
      %130 = vector.shape_cast %129 : vector<1x8x32xf32> to vector<8x32xf32>
      %c0_70 = arith.constant 0 : index
      %c0_71 = arith.constant 0 : index
      %131 = vector.load %arg8[%c0_70, %c0_71] : memref<32x32xf32, #tpu.memory_space<vmem>>, vector<32x32xf32>
      %cst_72 = arith.constant dense<0.000000e+00> : vector<8x32xf32>
      %132 = tpu.matmul %130, %131, %cst_72 {dimension_numbers = #tpu.dot_dimension_numbers<[1], [0], [0], [1], [0, 0, 1, 1], [], []>} : vector<8x32xf32>, vector<32x32xf32>, vector<8x32xf32> -> vector<8x32xf32>
      %c0_73 = arith.constant 0 : index
      %c0_74 = arith.constant 0 : index
      %133 = vector.load %arg9[%c0_73, %c0_74] : memref<1x32xf32, #tpu.memory_space<vmem>>, vector<1x32xf32>
      %134 = vector.broadcast %133 : vector<1x32xf32> to vector<8x32xf32>
      %135 = arith.addf %132, %134 : vector<8x32xf32>
      %c0_75 = arith.constant 0 : index
      %c0_76 = arith.constant 0 : index
      %136 = vector.load %arg15[%c0_75, %c0_76] : memref<8x32xf32, #tpu.memory_space<vmem>>, vector<8x32xf32>
      tpu.vector_store %arg15[%c0_75, %c0_76], %135 {strides = array<i32>} : memref<8x32xf32, #tpu.memory_space<vmem>>, vector<8x32xf32>,
      %c0_77 = arith.constant 0 : index
      %c0_78 = arith.constant 0 : index
      %137 = vector.load %arg10[%c0_77, %c0_78] : memref<32x32xf32, #tpu.memory_space<vmem>>, vector<32x32xf32>
      %cst_79 = arith.constant dense<0.000000e+00> : vector<8x32xf32>
      %138 = tpu.matmul %130, %137, %cst_79 {dimension_numbers = #tpu.dot_dimension_numbers<[1], [0], [0], [1], [0, 0, 1, 1], [], []>} : vector<8x32xf32>, vector<32x32xf32>, vector<8x32xf32> -> vector<8x32xf32>
      %c0_80 = arith.constant 0 : index
      %c0_81 = arith.constant 0 : index
      %139 = vector.load %arg11[%c0_80, %c0_81] : memref<1x32xf32, #tpu.memory_space<vmem>>, vector<1x32xf32>
      %140 = vector.broadcast %139 : vector<1x32xf32> to vector<8x32xf32>
      %141 = arith.addf %138, %140 : vector<8x32xf32>
      %c0_82 = arith.constant 0 : index
      %c0_83 = arith.constant 0 : index
      %142 = vector.load %arg16[%c0_82, %c0_83] : memref<8x32xf32, #tpu.memory_space<vmem>>, vector<8x32xf32>
      tpu.vector_store %arg16[%c0_82, %c0_83], %141 {strides = array<i32>} : memref<8x32xf32, #tpu.memory_space<vmem>>, vector<8x32xf32>,
    } else {
    }
    %c8_i32 = arith.constant 8 : i32
    %3 = arith.muli %arg1, %c8_i32 : i32
    %4 = tpu.assume_multiple %3, 8 : i32
    %c0 = arith.constant 0 : index
    %5 = arith.index_cast %4 : i32 to index
    %c0_1 = arith.constant 0 : index
    %6 = vector.load %arg2[%c0, %5, %c0_1] : memref<1x8x32xf32, #tpu.memory_space<vmem>>, vector<1x8x32xf32>
    %7 = vector.shape_cast %6 : vector<1x8x32xf32> to vector<8x32xf32>
    %c0_2 = arith.constant 0 : index
    %c0_3 = arith.constant 0 : index
    %8 = vector.load %arg4[%c0_2, %c0_3] : memref<1x32xf32, #tpu.memory_space<vmem>>, vector<1x32xf32>
    %c0_4 = arith.constant 0 : index
    %c0_5 = arith.constant 0 : index
    %9 = vector.load %arg5[%c0_4, %c0_5] : memref<1x32xf32, #tpu.memory_space<vmem>>, vector<1x32xf32>
    %cst = arith.constant dense<0.000000e+00> : vector<8xf32>
    %10 = vector.multi_reduction <add>, %7, %cst [1] : vector<8x32xf32> to vector<8xf32>
    %11 = vector.shape_cast %10 : vector<8xf32> to vector<8x1xf32>
    %cst_6 = arith.constant 3.200000e+01 : f32
    %12 = vector.broadcast %cst_6 : f32 to vector<8x1xf32>
    %13 = arith.divf %11, %12 : vector<8x1xf32>
    %14 = vector.broadcast %13 : vector<8x1xf32> to vector<8x32xf32>
    %15 = arith.subf %7, %14 : vector<8x32xf32>
    %16 = arith.mulf %15, %15 : vector<8x32xf32>
    %cst_7 = arith.constant dense<0.000000e+00> : vector<8xf32>
    %17 = vector.multi_reduction <add>, %16, %cst_7 [1] : vector<8x32xf32> to vector<8xf32>
    %18 = vector.shape_cast %17 : vector<8xf32> to vector<8x1xf32>
    %cst_8 = arith.constant 3.200000e+01 : f32
    %19 = vector.broadcast %cst_8 : f32 to vector<8x1xf32>
    %20 = arith.divf %18, %19 : vector<8x1xf32>
    %21 = vector.broadcast %13 : vector<8x1xf32> to vector<8x32xf32>
    %22 = arith.subf %7, %21 : vector<8x32xf32>
    %cst_9 = arith.constant 9.99999974E-6 : f32
    %23 = vector.broadcast %cst_9 : f32 to vector<8x1xf32>
    %24 = arith.addf %20, %23 : vector<8x1xf32>
    %25 = math.rsqrt %24 : vector<8x1xf32>
    %26 = vector.broadcast %25 : vector<8x1xf32> to vector<8x32xf32>
    %27 = arith.mulf %22, %26 : vector<8x32xf32>
    %28 = vector.broadcast %8 : vector<1x32xf32> to vector<8x32xf32>
    %29 = arith.mulf %27, %28 : vector<8x32xf32>
    %30 = vector.broadcast %9 : vector<1x32xf32> to vector<8x32xf32>
    %31 = arith.addf %29, %30 : vector<8x32xf32>
    %c0_10 = arith.constant 0 : index
    %c0_11 = arith.constant 0 : index
    %32 = vector.load %arg6[%c0_10, %c0_11] : memref<32x32xf32, #tpu.memory_space<vmem>>, vector<32x32xf32>
    %cst_12 = arith.constant dense<0.000000e+00> : vector<8x32xf32>
    %33 = tpu.matmul %31, %32, %cst_12 {dimension_numbers = #tpu.dot_dimension_numbers<[1], [0], [0], [1], [0, 0, 1, 1], [], []>} : vector<8x32xf32>, vector<32x32xf32>, vector<8x32xf32> -> vector<8x32xf32>
    %c0_13 = arith.constant 0 : index
    %c0_14 = arith.constant 0 : index
    %34 = vector.load %arg7[%c0_13, %c0_14] : memref<1x32xf32, #tpu.memory_space<vmem>>, vector<1x32xf32>
    %35 = vector.broadcast %34 : vector<1x32xf32> to vector<8x32xf32>
    %36 = arith.addf %33, %35 : vector<8x32xf32>
    %cst_15 = arith.constant 0.353553385 : f32
    %37 = vector.broadcast %cst_15 : f32 to vector<8x32xf32>
    %38 = arith.mulf %36, %37 : vector<8x32xf32>
    %39 = vector.extract_strided_slice %38 {offsets = [0, 0], sizes = [8, 8], strides = [1, 1]} : vector<8x32xf32> to vector<8x8xf32>
    %c0_16 = arith.constant 0 : index
    %c0_17 = arith.constant 0 : index
    %40 = vector.load %arg15[%c0_16, %c0_17] : memref<8x32xf32, #tpu.memory_space<vmem>>, vector<8x8xf32>
    %cst_18 = arith.constant dense<0.000000e+00> : vector<8x8xf32>
    %41 = tpu.matmul %39, %40, %cst_18 {dimension_numbers = #tpu.dot_dimension_numbers<[1], [1], [0], [0], [0, 0, 1, 0], [], []>} : vector<8x8xf32>, vector<8x8xf32>, vector<8x8xf32> -> vector<8x8xf32>
    %cst_19 = arith.constant dense<0xFF800000> : vector<8xf32>
    %42 = vector.multi_reduction <maximumf>, %41, %cst_19 [1] : vector<8x8xf32> to vector<8xf32>
    %43 = vector.shape_cast %42 : vector<8xf32> to vector<8x1xf32>
    %44 = vector.broadcast %43 : vector<8x1xf32> to vector<8x8xf32>
    %45 = arith.subf %41, %44 : vector<8x8xf32>
    %46 = math.exp %45 : vector<8x8xf32>
    %cst_20 = arith.constant dense<0.000000e+00> : vector<8xf32>
    %47 = vector.multi_reduction <add>, %46, %cst_20 [1] : vector<8x8xf32> to vector<8xf32>
    %48 = vector.shape_cast %47 : vector<8xf32> to vector<8x1xf32>
    %49 = tpu.reciprocal %48 {approx = true} : vector<8x1xf32> -> vector<8x1xf32>
    %50 = arith.mulf %48, %49 : vector<8x1xf32>
    %cst_21 = arith.constant 2.000000e+00 : f32
    %51 = vector.broadcast %cst_21 : f32 to vector<8x1xf32>
    %52 = arith.subf %51, %50 : vector<8x1xf32>
    %53 = arith.mulf %49, %52 : vector<8x1xf32>
    %54 = vector.broadcast %53 : vector<8x1xf32> to vector<8x8xf32>
    %55 = arith.mulf %46, %54 : vector<8x8xf32>
    %c0_22 = arith.constant 0 : index
    %c0_23 = arith.constant 0 : index
    %56 = vector.load %arg16[%c0_22, %c0_23] : memref<8x32xf32, #tpu.memory_space<vmem>>, vector<8x8xf32>
    %cst_24 = arith.constant dense<0.000000e+00> : vector<8x8xf32>
    %57 = tpu.matmul %55, %56, %cst_24 {dimension_numbers = #tpu.dot_dimension_numbers<[1], [0], [0], [1], [0, 0, 1, 1], [], []>} : vector<8x8xf32>, vector<8x8xf32>, vector<8x8xf32> -> vector<8x8xf32>
    %c0_25 = arith.constant 0 : index
    %c0_26 = arith.constant 0 : index
    %58 = vector.load %arg17[%c0_25, %c0_26] : memref<8x32xf32, #tpu.memory_space<vmem>>, vector<8x8xf32>
    tpu.vector_store %arg17[%c0_25, %c0_26], %57 {strides = array<i32>} : memref<8x32xf32, #tpu.memory_space<vmem>>, vector<8x8xf32>,
    %59 = vector.extract_strided_slice %38 {offsets = [0, 8], sizes = [8, 8], strides = [1, 1]} : vector<8x32xf32> to vector<8x8xf32>
    %c0_27 = arith.constant 0 : index
    %c8 = arith.constant 8 : index
    %60 = vector.load %arg15[%c0_27, %c8] : memref<8x32xf32, #tpu.memory_space<vmem>>, vector<8x8xf32>
    %cst_28 = arith.constant dense<0.000000e+00> : vector<8x8xf32>
    %61 = tpu.matmul %59, %60, %cst_28 {dimension_numbers = #tpu.dot_dimension_numbers<[1], [1], [0], [0], [0, 0, 1, 0], [], []>} : vector<8x8xf32>, vector<8x8xf32>, vector<8x8xf32> -> vector<8x8xf32>
    %cst_29 = arith.constant dense<0xFF800000> : vector<8xf32>
    %62 = vector.multi_reduction <maximumf>, %61, %cst_29 [1] : vector<8x8xf32> to vector<8xf32>
    %63 = vector.shape_cast %62 : vector<8xf32> to vector<8x1xf32>
    %64 = vector.broadcast %63 : vector<8x1xf32> to vector<8x8xf32>
    %65 = arith.subf %61, %64 : vector<8x8xf32>
    %66 = math.exp %65 : vector<8x8xf32>
    %cst_30 = arith.constant dense<0.000000e+00> : vector<8xf32>
    %67 = vector.multi_reduction <add>, %66, %cst_30 [1] : vector<8x8xf32> to vector<8xf32>
    %68 = vector.shape_cast %67 : vector<8xf32> to vector<8x1xf32>
    %69 = tpu.reciprocal %68 {approx = true} : vector<8x1xf32> -> vector<8x1xf32>
    %70 = arith.mulf %68, %69 : vector<8x1xf32>
    %cst_31 = arith.constant 2.000000e+00 : f32
    %71 = vector.broadcast %cst_31 : f32 to vector<8x1xf32>
    %72 = arith.subf %71, %70 : vector<8x1xf32>
    %73 = arith.mulf %69, %72 : vector<8x1xf32>
    %74 = vector.broadcast %73 : vector<8x1xf32> to vector<8x8xf32>
    %75 = arith.mulf %66, %74 : vector<8x8xf32>
    %c0_32 = arith.constant 0 : index
    %c8_33 = arith.constant 8 : index
    %76 = vector.load %arg16[%c0_32, %c8_33] : memref<8x32xf32, #tpu.memory_space<vmem>>, vector<8x8xf32>
    %cst_34 = arith.constant dense<0.000000e+00> : vector<8x8xf32>
    %77 = tpu.matmul %75, %76, %cst_34 {dimension_numbers = #tpu.dot_dimension_numbers<[1], [0], [0], [1], [0, 0, 1, 1], [], []>} : vector<8x8xf32>, vector<8x8xf32>, vector<8x8xf32> -> vector<8x8xf32>
    %c0_35 = arith.constant 0 : index
    %c8_36 = arith.constant 8 : index
    %78 = vector.load %arg17[%c0_35, %c8_36] : memref<8x32xf32, #tpu.memory_space<vmem>>, vector<8x8xf32>
    tpu.vector_store %arg17[%c0_35, %c8_36], %77 {strides = array<i32>} : memref<8x32xf32, #tpu.memory_space<vmem>>, vector<8x8xf32>,
    %79 = vector.extract_strided_slice %38 {offsets = [0, 16], sizes = [8, 8], strides = [1, 1]} : vector<8x32xf32> to vector<8x8xf32>
    %c0_37 = arith.constant 0 : index
    %c16 = arith.constant 16 : index
    %80 = vector.load %arg15[%c0_37, %c16] : memref<8x32xf32, #tpu.memory_space<vmem>>, vector<8x8xf32>
    %cst_38 = arith.constant dense<0.000000e+00> : vector<8x8xf32>
    %81 = tpu.matmul %79, %80, %cst_38 {dimension_numbers = #tpu.dot_dimension_numbers<[1], [1], [0], [0], [0, 0, 1, 0], [], []>} : vector<8x8xf32>, vector<8x8xf32>, vector<8x8xf32> -> vector<8x8xf32>
    %cst_39 = arith.constant dense<0xFF800000> : vector<8xf32>
    %82 = vector.multi_reduction <maximumf>, %81, %cst_39 [1] : vector<8x8xf32> to vector<8xf32>
    %83 = vector.shape_cast %82 : vector<8xf32> to vector<8x1xf32>
    %84 = vector.broadcast %83 : vector<8x1xf32> to vector<8x8xf32>
    %85 = arith.subf %81, %84 : vector<8x8xf32>
    %86 = math.exp %85 : vector<8x8xf32>
    %cst_40 = arith.constant dense<0.000000e+00> : vector<8xf32>
    %87 = vector.multi_reduction <add>, %86, %cst_40 [1] : vector<8x8xf32> to vector<8xf32>
    %88 = vector.shape_cast %87 : vector<8xf32> to vector<8x1xf32>
    %89 = tpu.reciprocal %88 {approx = true} : vector<8x1xf32> -> vector<8x1xf32>
    %90 = arith.mulf %88, %89 : vector<8x1xf32>
    %cst_41 = arith.constant 2.000000e+00 : f32
    %91 = vector.broadcast %cst_41 : f32 to vector<8x1xf32>
    %92 = arith.subf %91, %90 : vector<8x1xf32>
    %93 = arith.mulf %89, %92 : vector<8x1xf32>
    %94 = vector.broadcast %93 : vector<8x1xf32> to vector<8x8xf32>
    %95 = arith.mulf %86, %94 : vector<8x8xf32>
    %c0_42 = arith.constant 0 : index
    %c16_43 = arith.constant 16 : index
    %96 = vector.load %arg16[%c0_42, %c16_43] : memref<8x32xf32, #tpu.memory_space<vmem>>, vector<8x8xf32>
    %cst_44 = arith.constant dense<0.000000e+00> : vector<8x8xf32>
    %97 = tpu.matmul %95, %96, %cst_44 {dimension_numbers = #tpu.dot_dimension_numbers<[1], [0], [0], [1], [0, 0, 1, 1], [], []>} : vector<8x8xf32>, vector<8x8xf32>, vector<8x8xf32> -> vector<8x8xf32>
    %c0_45 = arith.constant 0 : index
    %c16_46 = arith.constant 16 : index
    %98 = vector.load %arg17[%c0_45, %c16_46] : memref<8x32xf32, #tpu.memory_space<vmem>>, vector<8x8xf32>
    tpu.vector_store %arg17[%c0_45, %c16_46], %97 {strides = array<i32>} : memref<8x32xf32, #tpu.memory_space<vmem>>, vector<8x8xf32>,
    %99 = vector.extract_strided_slice %38 {offsets = [0, 24], sizes = [8, 8], strides = [1, 1]} : vector<8x32xf32> to vector<8x8xf32>
    %c0_47 = arith.constant 0 : index
    %c24 = arith.constant 24 : index
    %100 = vector.load %arg15[%c0_47, %c24] : memref<8x32xf32, #tpu.memory_space<vmem>>, vector<8x8xf32>
    %cst_48 = arith.constant dense<0.000000e+00> : vector<8x8xf32>
    %101 = tpu.matmul %99, %100, %cst_48 {dimension_numbers = #tpu.dot_dimension_numbers<[1], [1], [0], [0], [0, 0, 1, 0], [], []>} : vector<8x8xf32>, vector<8x8xf32>, vector<8x8xf32> -> vector<8x8xf32>
    %cst_49 = arith.constant dense<0xFF800000> : vector<8xf32>
    %102 = vector.multi_reduction <maximumf>, %101, %cst_49 [1] : vector<8x8xf32> to vector<8xf32>
    %103 = vector.shape_cast %102 : vector<8xf32> to vector<8x1xf32>
    %104 = vector.broadcast %103 : vector<8x1xf32> to vector<8x8xf32>
    %105 = arith.subf %101, %104 : vector<8x8xf32>
    %106 = math.exp %105 : vector<8x8xf32>
    %cst_50 = arith.constant dense<0.000000e+00> : vector<8xf32>
    %107 = vector.multi_reduction <add>, %106, %cst_50 [1] : vector<8x8xf32> to vector<8xf32>
    %108 = vector.shape_cast %107 : vector<8xf32> to vector<8x1xf32>
    %109 = tpu.reciprocal %108 {approx = true} : vector<8x1xf32> -> vector<8x1xf32>
    %110 = arith.mulf %108, %109 : vector<8x1xf32>
    %cst_51 = arith.constant 2.000000e+00 : f32
    %111 = vector.broadcast %cst_51 : f32 to vector<8x1xf32>
    %112 = arith.subf %111, %110 : vector<8x1xf32>
    %113 = arith.mulf %109, %112 : vector<8x1xf32>
    %114 = vector.broadcast %113 : vector<8x1xf32> to vector<8x8xf32>
    %115 = arith.mulf %106, %114 : vector<8x8xf32>
    %c0_52 = arith.constant 0 : index
    %c24_53 = arith.constant 24 : index
    %116 = vector.load %arg16[%c0_52, %c24_53] : memref<8x32xf32, #tpu.memory_space<vmem>>, vector<8x8xf32>
    %cst_54 = arith.constant dense<0.000000e+00> : vector<8x8xf32>
    %117 = tpu.matmul %115, %116, %cst_54 {dimension_numbers = #tpu.dot_dimension_numbers<[1], [0], [0], [1], [0, 0, 1, 1], [], []>} : vector<8x8xf32>, vector<8x8xf32>, vector<8x8xf32> -> vector<8x8xf32>
    %c0_55 = arith.constant 0 : index
    %c24_56 = arith.constant 24 : index
    %118 = vector.load %arg17[%c0_55, %c24_56] : memref<8x32xf32, #tpu.memory_space<vmem>>, vector<8x8xf32>
    tpu.vector_store %arg17[%c0_55, %c24_56], %117 {strides = array<i32>} : memref<8x32xf32, #tpu.memory_space<vmem>>, vector<8x8xf32>,
    %c0_57 = arith.constant 0 : index
    %c0_58 = arith.constant 0 : index
    %119 = vector.load %arg17[%c0_57, %c0_58] : memref<8x32xf32, #tpu.memory_space<vmem>>, vector<8x32xf32>
    %c0_59 = arith.constant 0 : index
    %c0_60 = arith.constant 0 : index
    %120 = vector.load %arg12[%c0_59, %c0_60] : memref<32x32xf32, #tpu.memory_space<vmem>>, vector<32x32xf32>
    %cst_61 = arith.constant dense<0.000000e+00> : vector<8x32xf32>
    %121 = tpu.matmul %119, %120, %cst_61 {dimension_numbers = #tpu.dot_dimension_numbers<[1], [0], [0], [1], [0, 0, 1, 1], [], []>} : vector<8x32xf32>, vector<32x32xf32>, vector<8x32xf32> -> vector<8x32xf32>
    %c0_62 = arith.constant 0 : index
    %c0_63 = arith.constant 0 : index
    %122 = vector.load %arg13[%c0_62, %c0_63] : memref<1x32xf32, #tpu.memory_space<vmem>>, vector<1x32xf32>
    %123 = vector.broadcast %122 : vector<1x32xf32> to vector<8x32xf32>
    %124 = arith.addf %121, %123 : vector<8x32xf32>
    %125 = arith.addf %7, %124 : vector<8x32xf32>
    %c0_64 = arith.constant 0 : index
    %c0_65 = arith.constant 0 : index
    %c0_66 = arith.constant 0 : index
    %126 = vector.load %arg14[%c0_64, %c0_65, %c0_66] : memref<1x8x32xf32, #tpu.memory_space<vmem>>, vector<1x8x32xf32>
    %127 = vector.shape_cast %126 : vector<1x8x32xf32> to vector<8x32xf32>
    %128 = vector.shape_cast %125 : vector<8x32xf32> to vector<1x8x32xf32>
    tpu.vector_store %arg14[%c0_64, %c0_65, %c0_66], %128 {strides = array<i32>} : memref<1x8x32xf32, #tpu.memory_space<vmem>>, vector<1x8x32xf32>,
    return
  }
  func.func @transform_0(%arg0: i32, %arg1: i32) -> (i32, i32, i32) {
    %c0_i32 = arith.constant 0 : i32
    %c0_i32_0 = arith.constant 0 : i32
    %c0_i32_1 = arith.constant 0 : i32
    return %arg0, %c0_i32, %c0_i32_0 : i32, i32, i32
  }
  func.func @transform_1(%arg0: i32, %arg1: i32) -> (i32, i32, i32) {
    %c0_i32 = arith.constant 0 : i32
    %c0_i32_0 = arith.constant 0 : i32
    %c0_i32_1 = arith.constant 0 : i32
    return %arg0, %c0_i32, %c0_i32_0 : i32, i32, i32
  }
  func.func @transform_2(%arg0: i32, %arg1: i32) -> (i32, i32) {
    %c0_i32 = arith.constant 0 : i32
    %c0_i32_0 = arith.constant 0 : i32
    %c0_i32_1 = arith.constant 0 : i32
    return %c0_i32, %c0_i32_0 : i32, i32
  }
  func.func @transform_3(%arg0: i32, %arg1: i32) -> (i32, i32) {
    %c0_i32 = arith.constant 0 : i32
    %c0_i32_0 = arith.constant 0 : i32
    %c0_i32_1 = arith.constant 0 : i32
    return %c0_i32, %c0_i32_0 : i32, i32
  }
  func.func @transform_4(%arg0: i32, %arg1: i32) -> (i32, i32) {
    %c0_i32 = arith.constant 0 : i32
    %c0_i32_0 = arith.constant 0 : i32
    %c0_i32_1 = arith.constant 0 : i32
    return %c0_i32, %c0_i32_0 : i32, i32
  }
  func.func @transform_5(%arg0: i32, %arg1: i32) -> (i32, i32) {
    %c0_i32 = arith.constant 0 : i32
    %c0_i32_0 = arith.constant 0 : i32
    %c0_i32_1 = arith.constant 0 : i32
    return %c0_i32, %c0_i32_0 : i32, i32
  }
  func.func @transform_6(%arg0: i32, %arg1: i32) -> (i32, i32) {
    %c0_i32 = arith.constant 0 : i32
    %c0_i32_0 = arith.constant 0 : i32
    %c0_i32_1 = arith.constant 0 : i32
    return %c0_i32, %c0_i32_0 : i32, i32
  }
  func.func @transform_7(%arg0: i32, %arg1: i32) -> (i32, i32) {
    %c0_i32 = arith.constant 0 : i32
    %c0_i32_0 = arith.constant 0 : i32
    %c0_i32_1 = arith.constant 0 : i32
    return %c0_i32, %c0_i32_0 : i32, i32
  }
  func.func @transform_8(%arg0: i32, %arg1: i32) -> (i32, i32) {
    %c0_i32 = arith.constant 0 : i32
    %c0_i32_0 = arith.constant 0 : i32
    %c0_i32_1 = arith.constant 0 : i32
    return %c0_i32, %c0_i32_0 : i32, i32
  }
  func.func @transform_9(%arg0: i32, %arg1: i32) -> (i32, i32) {
    %c0_i32 = arith.constant 0 : i32
    %c0_i32_0 = arith.constant 0 : i32
    %c0_i32_1 = arith.constant 0 : i32
    return %c0_i32, %c0_i32_0 : i32, i32
  }
  func.func @transform_10(%arg0: i32, %arg1: i32) -> (i32, i32) {
    %c0_i32 = arith.constant 0 : i32
    %c0_i32_0 = arith.constant 0 : i32
    %c0_i32_1 = arith.constant 0 : i32
    return %c0_i32, %c0_i32_0 : i32, i32
  }
  func.func @transform_11(%arg0: i32, %arg1: i32) -> (i32, i32) {
    %c0_i32 = arith.constant 0 : i32
    %c0_i32_0 = arith.constant 0 : i32
    %c0_i32_1 = arith.constant 0 : i32
    return %c0_i32, %c0_i32_0 : i32, i32
  }
  func.func @transform_12(%arg0: i32, %arg1: i32) -> (i32, i32, i32) {
    %c0_i32 = arith.constant 0 : i32
    %c0_i32_0 = arith.constant 0 : i32
    return %arg0, %arg1, %c0_i32 : i32, i32, i32
  }
}

</mosaic_0001>

<bundles_post_ra>
// kernel: decoder_layer.5
= control target key start
LH: loop header
LB: loop body
LE: loop exit
PB: predicated region body
PF: predicated region fallthrough
CT: control target
= control target key end

     0   :  { %vm34_vm0 = vcmask 261120   ;;  %v394_v50 = vmov 0.0   ;;  %vm197_vm1 = vcmask 523264   ;;  %s519_s0 = inlined_call_operand.vmem [shape: f32[16,32], index: 0, kind: input, shape index: {}, may-alias: {0,7}]   ;;  %s520_s3 = inlined_call_operand.vmem [shape: f32[32,64], index: 3, kind: input, shape index: {}]   ;;  %s521_s1 = inlined_call_operand.vmem [shape: f32[1,32], index: 1, kind: input, shape index: {}]   ;;  %s522_s2 = inlined_call_operand.vmem [shape: f32[1,32], index: 2, kind: input, shape index: {}]   ;;  %s523_s5 = inlined_call_operand.vmem [shape: f32[64,32], index: 5, kind: input, shape index: {}]   ;;  %s524_s4 = inlined_call_operand.vmem [shape: f32[1,64], index: 4, kind: input, shape index: {}]   ;;  %s525_s6 = inlined_call_operand.vmem [shape: f32[1,32], index: 6, kind: input, shape index: {}]   ;;  %s526_s7 = inlined_call_operand.vmem [shape: f32[16,32], index: 7, kind: output, shape index: {}, may-alias: {0,7}]  }
   0x1   :  { %v438_v0 = vld [vmem:[%s519_s0] sm:$0xff]  ;;  %v443_v1 = vld [vmem:[%s519_s0 + $0x8] sm:$0xff]  ;;  %v86_v17 = vld [vmem:[%s520_s3 + $0x10] sm:$0xff]  ;;  %81 = vst.msk [vmem:[#allocation3 + $0x8] sm:$0xff] %vm34_vm0, %v394_v50 }
   0x2   :  { %v35_v2 = vsel %vm34_vm0, %v438_v0, 0.0  ;;  %v38_v3 = vsel %vm34_vm0, %v443_v1, 0.0  ;;  %v84_v14 = vld [vmem:[%s520_s3] sm:$0xff]  ;;  %v85_v15 = vld [vmem:[%s520_s3 + $0x8] sm:$0xff]  ;;  %v87_v18 = vld [vmem:[%s520_s3 + $0x18] sm:$0xff]  ;;  %80 = vst.msk [vmem:[#allocation3] sm:$0xff] %vm34_vm0, %v394_v50 }
   0x3   :  { %36 = vadd.xlane.f32.xlu0 %v35_v2  ;;  %v361_v16 = vpack.c.bf16 %v85_v15, %v84_v14  ;;  %v365_v19 = vpack.c.bf16 %v87_v18, %v86_v17  ;;  %v307_v27 = vld [vmem:[%s521_s1] ss:$0 sm:$0xff]  ;;  %v190_v39 = vld [vmem:[%s523_s5 + $0x8] sm:$0xff]  ;;  %v191_v41 = vld [vmem:[%s523_s5 + $0x10] sm:$0xff] }
   0x4   :  { %v308_v29 = vld [vmem:[%s522_s2] ss:$0 sm:$0xff]  ;;  %v192_v42 = vld [vmem:[%s523_s5 + $0x18] sm:$0xff]  ;;  %v194_v45 = vld [vmem:[%s523_s5 + $0x28] sm:$0xff] }
   0x5   :  { %362 = vmatprep.subr.bf16.mxu0 %v361_v16  ;;  %v189_v38 = vld [vmem:[%s523_s5] sm:$0xff]  ;;  %v373_v43 = vpack.c.bf16 %v192_v42, %v191_v41  ;;  %v195_v47 = vld [vmem:[%s523_s5 + $0x30] sm:$0xff]  ;;  %v196_v48 = vld [vmem:[%s523_s5 + $0x38] sm:$0xff] }
   0x6   :  { %364 = vmatpush3.bf16.msra.mxu0 %v361_v16  ;;  %v369_v40 = vpack.c.bf16 %v190_v39, %v189_v38  ;;  %v193_v44 = vld [vmem:[%s523_s5 + $0x20] sm:$0xff]  ;;  %v381_v49 = vpack.c.bf16 %v196_v48, %v195_v47 }
   0x7   :  { %39 = vadd.xlane.f32.xlu0 %v38_v3  ;;  %366 = vmatprep.subr.bf16.mxu0 %v365_v19  ;;  %v377_v46 = vpack.c.bf16 %v194_v45, %v193_v44  ;;  %v309_v51 = vld [vmem:[%s524_s4] ss:$0 sm:$0xff] }
   0x8   :  { %370 = vmatprep.subr.bf16.mxu1 %v369_v40 }
   0x9   :  { %372 = vmatpush3.bf16.msra.mxu1 %v369_v40 }
   0xa   :  { %368 = vmatpush3.bf16.msra.mxu0 %v365_v19  ;;  %374 = vmatprep.subr.bf16.mxu1 %v373_v43 }
   0xd   :  { %376 = vmatpush3.bf16.msra.mxu1 %v373_v43 }
   0xe   :  { %378 = vmatprep.subr.bf16.mxu1 %v377_v46 }
  0x11   :  { %380 = vmatpush3.bf16.msra.mxu1 %v377_v46 }
  0x12   :  { %382 = vmatprep.subr.bf16.mxu1 %v381_v49 }
  0x15   :  { %384 = vmatpush3.bf16.msra.mxu1 %v381_v49 }
  0x90   :  { %v37_v4 = vpop.xlane.xlu0 %36 }
  0x91   :  { %v42_v5 = vmul.f32 0.03125, %v37_v4  ;;  %v188_v4 = vld [vmem:[#allocation3 + $0x8] sm:$0xff] }
  0x93   :  { %v44_v6 = vsub.f32 %v438_v0, %v42_v5  ;;  %v187_v5 = vld [vmem:[#allocation3] sm:$0xff] }
  0x94   :  { %v40_v7 = vpop.xlane.xlu0 %39 }
  0x95   :  { %v43_v8 = vmul.f32 0.03125, %v40_v7  ;;  %v46_v9 = vmul.f32 %v44_v6, %v44_v6 }
  0x97   :  { %v45_v10 = vsub.f32 %v443_v1, %v43_v8  ;;  %v48_v11 = vsel %vm34_vm0, %v46_v9, 0.0 }
  0x98   :  { %49 = vadd.xlane.f32.xlu1 %v48_v11  ;;  %v314_v11 = vld [vmem:[%s525_s6] ss:$0 sm:$0xff] }
  0x99   :  { %v47_v12 = vmul.f32 %v45_v10, %v45_v10 }
  0x9b   :  { %v51_v13 = vsel %vm34_vm0, %v47_v12, 0.0 }
  0x9c   :  { %52 = vadd.xlane.f32.xlu1 %v51_v13 }
 0x125   :  { %v50_v20 = vpop.xlane.xlu1 %49 }
 0x126   :  { %v54_v21 = vmul.f32 0.03125, %v50_v20 }
 0x128   :  { %v56_v22 = vadd.f32 1e-05, %v54_v21 }
 0x129   :  { %v53_v23 = vpop.xlane.xlu1 %52 }
 0x12a   :  { %386 = vrsqrt.f32 %v56_v22  ;;  %v55_v24 = vmul.f32 0.03125, %v53_v23 }
 0x12c   :  { %v57_v25 = vadd.f32 1e-05, %v55_v24 }
 0x12e   :  { %388 = vrsqrt.f32 %v57_v25 }
 0x134   :  { %v387_v26 = vpop.eup %386 }
 0x135   :  { %v60_v28 = vmul.f32 %v387_v26, %v44_v6 }
 0x137   :  { %v68_v30 = vmul.f32 %v307_v27, %v60_v28 }
 0x138   :  { %v389_v31 = vpop.eup %388 }
 0x139   :  { %v76_v32 = vadd.f32 %v308_v29, %v68_v30  ;;  %v61_v33 = vmul.f32 %v389_v31, %v45_v10 }
 0x13b   :  { %78 = vst.msk [vmem:[#allocation2] sm:$0xff] %vm34_vm0, %v76_v32  ;;  %v69_v34 = vmul.f32 %v307_v27, %v61_v33 }
 0x13d   :  { %v77_v35 = vadd.f32 %v308_v29, %v69_v34 }
 0x13f   :  { %79 = vst.msk [vmem:[#allocation2 + $0x8] sm:$0xff] %vm34_vm0, %v77_v35 }
 0x142   :  { %v82_v36 = vld [vmem:[#allocation2] sm:$0xff] }
 0x143   :  { %339 = vmatprep.mubr.msk.f32.mxu0 %vm34_vm0, %v82_v36 }
 0x146   :  { %v83_v37 = vld [vmem:[#allocation2 + $0x8] sm:$0xff] }
 0x147   :  { %340 = vmatmul.mubr.msk.f32.vlgmr.msra.gmra.mrb[0].mxu0 %vm34_vm0, %v83_v37 }
 0x21a   :  { %v341_v52 = vpop.f32.mrb[0].mxu0 }
 0x21b   :  { %v174_v53 = vadd.f32 %v341_v52, %v309_v51  ;;  %v168_v54 = vpop.f32.mrb[1].mxu0 }
 0x21c   :  { %v169_v55 = vadd.f32 %v309_v51, %v168_v54 }
 0x21d   :  { %v180_v56 = vmul.f32 0.70710677, %v174_v53  ;;  %v178_v63 = vmul.f32 0.5, %v174_v53 }
 0x21e   :  { %v179_v57 = vmul.f32 0.70710677, %v169_v55  ;;  %v177_v61 = vmul.f32 0.5, %v169_v55 }
 0x21f   :  { %390 = verf.f32 %v180_v56 }
 0x220   :  { %392 = verf.f32 %v179_v57 }
 0x229   :  { %v391_v58 = vpop.eup %390 }
 0x22a   :  { %v393_v59 = vpop.eup %392  ;;  %v184_v60 = vadd.f32 1.0, %v391_v58 }
 0x22b   :  { %v183_v62 = vadd.f32 1.0, %v393_v59 }
 0x22c   :  { %v186_v3 = vmul.f32 %v184_v60, %v178_v63 }
 0x22d   :  { %v185_v2 = vmul.f32 %v183_v62, %v177_v61 }
 0x22f   :  { %358 = vmatprep.mubr.msk.f32.mxu1 %vm197_vm1, %v185_v2 }
 0x230   :  { %359 = vmatmul.mubr.msk.f32.vlgmr.msra.gmra.mrb[0].mxu1 %vm197_vm1, %v186_v3 }
 0x303   :  { %v360_v6 = vpop.f32.mrb[0].mxu1 }
 0x304   :  { %v280_v7 = vadd.f32 %v360_v6, %v188_v4  ;;  %v270_v8 = vpop.f32.mrb[1].mxu1 }
 0x305   :  { %v279_v9 = vadd.f32 %v270_v8, %v187_v5 }
 0x306   :  { %282 = vst.msk [vmem:[#allocation3 + $0x8] sm:$0xff] %vm34_vm0, %v280_v7 }
 0x307   :  { %281 = vst.msk [vmem:[#allocation3] sm:$0xff] %vm34_vm0, %v279_v9 }
 0x30d   :  { %v289_v10 = vld [vmem:[#allocation3 + $0x8] sm:$0xff] }
 0x30e   :  { %v291_v12 = vadd.f32 %v289_v10, %v443_v1  ;;  %v288_v13 = vld [vmem:[#allocation3] sm:$0xff] }
 0x30f   :  { %v290_v14 = vadd.f32 %v288_v13, %v438_v0 }
 0x310   :  { %v300_v15 = vadd.f32 %v314_v11, %v291_v12 }
 0x311   :  { %v299_v16 = vadd.f32 %v314_v11, %v290_v14 }
 0x312   :  { %302 = vst.msk [vmem:[%s526_s7 + $0x8] sm:$0xff] %vm34_vm0, %v300_v15 }
 0x313   :  { %301 = vst.msk [vmem:[%s526_s7] sm:$0xff] %vm34_vm0, %v299_v16 }

// kernel: decoder_layer.3
= control target key start
LH: loop header
LB: loop body
LE: loop exit
PB: predicated region body
PF: predicated region fallthrough
CT: control target
= control target key end

     0   :  { %s2506_s0 = inlined_call_operand.hbm [shape: f32[2,8,32], index: 0, kind: input, shape index: {}]   ;;  %s2507_s1 = inlined_call_operand.hbm [shape: f32[1,32], index: 1, kind: input, shape index: {}]   ;;  %s2508_s2 = inlined_call_operand.hbm [shape: f32[1,32], index: 2, kind: input, shape index: {}]   ;;  %s2509_s3 = inlined_call_operand.vmem [shape: f32[32,32], index: 3, kind: input, shape index: {}]   ;;  %s2510_s4 = inlined_call_operand.vmem [shape: f32[1,32], index: 4, kind: input, shape index: {}]   ;;  %s2511_s5 = inlined_call_operand.vmem [shape: f32[32,32], index: 5, kind: input, shape index: {}]   ;;  %s2512_s6 = inlined_call_operand.vmem [shape: f32[1,32], index: 6, kind: input, shape index: {}]   ;;  %s2513_s7 = inlined_call_operand.vmem [shape: f32[32,32], index: 7, kind: input, shape index: {}]   ;;  %s2514_s8 = inlined_call_operand.vmem [shape: f32[1,32], index: 8, kind: input, shape index: {}]   ;;  %s2515_s9 = inlined_call_operand.vmem [shape: f32[32,32], index: 9, kind: input, shape index: {}]   ;;  %s2516_s10 = inlined_call_operand.vmem [shape: f32[1,32], index: 10, kind: input, shape index: {}]   ;;  %s2517_s11 = inlined_call_operand.vmem [shape: f32[2,8,32], index: 11, kind: output, shape index: {}]  }
   0x1   :  { %2522 = sst [smem:[#allocation12_spill]] %s2507_s1 }
   0x2   :  { %2523 = sst [smem:[#allocation13_spill]] %s2517_s11 }
   0x3   :  { %16 = vsyncpa [#allocation6], 0 }
   0x4   :  { %18 = vsyncpa [#allocation6 + $0x1], 0 }
   0x5   :  { %19 = vsyncpa [#allocation8], 0  ;;  %s2163_s17 = smov 0   ;;  %s2165_s18 = smov 0  }
   0x6   :  { %s2167_s19 = smov 0   ;;  %s2169_s20 = smov 0  }
   0x7   :  { %s2171_s21 = smov 0   ;;  %s2173_s22 = smov 0  }
   0x8 LB: > { %s1661_s23 = sadd.s32 4294967295, %s2089_s22   ;;  %p57_p0 = scmp.ne.s32.totalorder %s2073_s18, %s2069_s17  ;;  %s2089_s22 = sphi %s2173_s22, %s25_s22   ;;  %s2085_s21 = sphi %s2171_s21, %s2538_s21   ;;  %s2081_s20 = sphi %s2169_s20, %s2537_s20   ;;  %s2077_s19 = sphi %s2167_s19, %s2536_s19   ;;  %s2073_s18 = sphi %s2165_s18, %s2535_s18   ;;  %s2069_s17 = sphi %s2163_s17, %s2534_s17  }
   0x9   : > { %p2193_p1 = scmp.eq.s32.totalorder %s1661_s23, 0  ;;  %p1663_p2 = scmp.ge.s32.totalorder %s2089_s22, 1 }
   0xa   : > { %p306_p3 = scmp.lt.s32.totalorder %s2089_s22, 3  ;;  %s2091_s27 = smov [#allocation7]  }
   0xb   : > { %s2524_s24 = scalar_select %p2193_p1, 1, 0 }
   0xc   : > { %p2201_p4 = por %p2193_p1, %p57_p0  ;;  %p2205_p5 = pnand %p1663_p2, %p306_p3 }
   0xd   : > { %s319_s28 = sshll.u32 %s2091_s27, 4  ;;  %s2092_s29 = smov [#allocation9]   ;;  %s320_s28 = int_to_ptr.vmem [resolvable:$true] %s319_s28 }
   0xe   : > { %s2525_s25 = scalar_select %p2201_p4, 1, 0 }
   0xf   : > { %s2526_s26 = scalar_select %p2205_p5, 1, 0 }
  0x10   : > { %p1854_p6 = pneg %p2205_p5  ;;  %s330_s30 = sshll.u32 %s2092_s29, 4  ;;  %s2217_s30 = int_to_ptr.vmem [resolvable:$true] %s330_s30 }
  0x11   : > { %s2528_s1 = sld [smem:[#allocation12_spill]] }
  0x12   : > { %p2213_p7 = pnand %p1854_p6, %p2193_p1 }
  0x14   : > { %p1951_p9 = pneg %p2213_p7 }
  0x17   : > { %s1949_s15 = scalar_lea.hbm %s2528_s1, 16 }
  0x18   : > { %p1950_p8 = scmp.ne.s32.totalorder %s2528_s1, %s1949_s15  ;;  %p1956_p12 = scmp.lt.u32.totalorder %s1949_s15, %s2528_s1 }
  0x1a   : > { %p1952_p10 = pnand %p1951_p9, %p1950_p8 }
  0x1c   : > { %p1953_p11 = pneg %p1952_p10 }
  0x1e   : > { %p1958_p13 = pnand %p1956_p12, %p1953_p11 }
  0x20   : > { %1961 = shalt.err (!%p1958_p13)
}
  0x21   : > { %s1962_s29 = scalar_lea.vmem %s320_s28, 16  ;;  %s1969_s13 = scalar_lea.vmem %s320_s28, 32 }
  0x22   : > { %p1963_p0 = scmp.ne.s32.totalorder %s320_s28, %s1962_s29  ;;  %p1970_p6 = scmp.lt.s32.totalorder %s320_s28, %s320_s28 }
  0x23   : > { %p1971_p1 = scmp.lt.s32.totalorder %s1969_s13, %s1962_s29 }
  0x24   : > { %p1965_p2 = pnand %p1963_p0, %p1951_p9 }
  0x25   : > { %p1972_p4 = por %p1971_p1, %p1970_p6 }
  0x26   : > { %p1966_p3 = pneg %p1965_p2 }
  0x28   : > { %p1973_p5 = pnand %p1972_p4, %p1966_p3 }
  0x2a   : > { %1976 = shalt.err (!%p1973_p5)
}
  0x2b   : > { %1857 = dma.hbm_to_vmem [thread:$0]  (!%p2213_p7), %s2528_s1, 16, %s320_s28, [#allocation8]  }
  0x2c   : > { %s1977_s23 = scalar_lea.hbm %s2508_s2, 16 }
  0x2d   : > { %p1978_p8 = scmp.ne.s32.totalorder %s2508_s2, %s1977_s23  ;;  %p1984_p5 = scmp.lt.u32.totalorder %s1977_s23, %s2508_s2 }
  0x2f   : > { %p1980_p1 = pnand %p1978_p8, %p1951_p9 }
  0x31   : > { %p1981_p4 = pneg %p1980_p1 }
  0x33   : > { %p1986_p10 = pnand %p1984_p5, %p1981_p4 }
  0x35   : > { %1989 = shalt.err (!%p1986_p10)
}
  0x36   : > { %s1990_s28 = scalar_lea.vmem %s2217_s30, 16  ;;  %s1997_s11 = scalar_lea.vmem %s2217_s30, 32 }
  0x37   : > { %p1991_p11 = scmp.ne.s32.totalorder %s2217_s30, %s1990_s28  ;;  %p1998_p0 = scmp.lt.s32.totalorder %s2217_s30, %s2217_s30 }
  0x38   : > { %p1999_p2 = scmp.lt.s32.totalorder %s1997_s11, %s1990_s28 }
  0x39   : > { %p1993_p12 = pnand %p1991_p11, %p1951_p9 }
  0x3a   : > { %p2000_p3 = por %p1999_p2, %p1998_p0 }
  0x3b   : > { %p1994_p13 = pneg %p1993_p12 }
  0x3d   : > { %p2001_p6 = pnand %p2000_p3, %p1994_p13 }
  0x3f   : > { %2004 = shalt.err (!%p2001_p6)
}
  0x40   : > { %1860 = dma.hbm_to_vmem [thread:$0]  (!%p2213_p7), %s2508_s2, 16, %s2217_s30, [#allocation8]  }
  0x41   : > { %s37_s15 = sadd.s32 1, %s2085_s21  ;;  %s44_s17 = sadd.s32 1, %s2077_s19 }
  0x42   : > { %p39_p9 = scmp.ge.s32.totalorder %s37_s15, 2  ;;  %p51_p8 = scmp.ne.s32.totalorder %s2077_s19, %s2073_s18 }
  0x43   : > { %p52_p1 = scmp.eq.s32.totalorder %s2089_s22, 0  ;;  %p1867_p4 = scmp.lt.s32.totalorder %s2089_s22, 2 }
  0x44   : > { %s2540_s15 = smov (%p39_p9, %s37_s15), 0  ;;  %s365_s12 = sand.u32 1, %s2077_s19  }
  0x45   : > { %p53_p5 = por %p52_p1, %p51_p8  ;;  %s41_s23 = ssub.s32 %s2085_s21, %s2540_s15 }
  0x46   : > { %p42_p10 = scmp.eq.s32.totalorder %s41_s23, 0  ;;  %s1667_s27 = sshll.u32 %s365_s12, 3 }
  0x47   : > { %s1668_s29 = sshll.u32 %s2085_s21, 7  ;;  %s369_s14 = scalar_lea.vmem [#allocation5], %s1667_s27 }
  0x48   : > { %s2280_s13 = scalar_select %p42_p10, %s2077_s19, %s44_s17  }
  0x49   : > { %s2285_s11 = scalar_lea.hbm %s2506_s0, %s1668_s29  ;;  %s376_s16 = sshll.u32 %s369_s14, 4  ;;  %s2287_s16 = int_to_ptr.vmem [resolvable:$true] %s376_s16 }
  0x4a   : > { %p2291_p7 = pnand %p1867_p4, %p53_p5  ;;  %s366_s17 = scalar_lea.sflag [#allocation6], %s365_s12 }
  0x4b   : > { %s2005_s1 = scalar_lea.hbm %s2285_s11, 128  ;;  %s2010_s28 = scalar_lea.hbm %s2506_s0, 256 }
  0x4c   : > { %p2006_p11 = scmp.ne.s32.totalorder %s2285_s11, %s2005_s1  ;;  %p2007_p12 = pneg %p2291_p7 }
  0x4d   : > { %p2011_p2 = scmp.lt.u32.totalorder %s2285_s11, %s2506_s0  ;;  %p2012_p3 = scmp.lt.u32.totalorder %s2010_s28, %s2005_s1 }
  0x4e   : > { %p2008_p13 = pnand %p2007_p12, %p2006_p11  ;;  %p2014_p9 = scmp.lt.u32.totalorder %s2005_s1, %s2285_s11 }
  0x4f   : > { %p2013_p6 = por %p2012_p3, %p2011_p2 }
  0x50   : > { %p2009_p0 = pneg %p2008_p13 }
  0x51   : > { %p2015_p8 = por %p2014_p9, %p2013_p6 }
  0x53   : > { %p2016_p1 = pnand %p2015_p8, %p2009_p0 }
  0x55   : > { %2019 = shalt.err (!%p2016_p1)
}
  0x56   : > { %s2020_s12 = scalar_lea.vmem %s2287_s16, 128  ;;  %s2093_s27 = smov [#allocation5]  }
  0x57   : > { %p2021_p4 = scmp.ne.s32.totalorder %s2287_s16, %s2020_s12  ;;  %s2025_s29 = sshll.u32 %s2093_s27, 4  ;;  %s2026_s29 = int_to_ptr.vmem [resolvable:$false] %s2025_s29 }
  0x58   : > { %s2027_s30 = scalar_lea.vmem %s2026_s29, 256  ;;  %p2028_p11 = scmp.lt.s32.totalorder %s2287_s16, %s2026_s29 }
  0x59   : > { %p2023_p5 = pnand %p2021_p4, %p2007_p12  ;;  %p2029_p13 = scmp.lt.s32.totalorder %s2027_s30, %s2020_s12 }
  0x5b   : > { %p2024_p10 = pneg %p2023_p5  ;;  %p2030_p2 = por %p2029_p13, %p2028_p11 }
  0x5d   : > { %p2031_p3 = pnand %p2030_p2, %p2024_p10 }
  0x5f   : > { %2034 = shalt.err (!%p2031_p3)
}
  0x60   : > { %1864 = dma.hbm_to_vmem [thread:$0]  (!%p2291_p7), %s2285_s11, 128, %s2287_s16, %s366_s17  }
  0x61   : > { %p2530_p0 = scmp.ne.s32.totalorder %s2526_s26, 0 }
  0x62   : > { %s387_s1 = sand.u32 (!%p2530_p0), 1, %s2073_s18   ;;  %p2531_p12 = scmp.ne.s32.totalorder (!%p2530_p0), %s2525_s25, 0 }
  0x63   : > { %385 = sbr.rel (%p2530_p0) target bundleno = 2278 (0x8e6), region = 64  ;;  %s1670_s28 = sshll.u32 (!%p2530_p0), %s387_s1, 3 }
  0x64   : > { %s388_s14 = scalar_lea.sflag (!%p2530_p0), [#allocation6], %s387_s1  ;;  %s391_s27 = scalar_lea.vmem (!%p2530_p0), [#allocation5], %s1670_s28 }
  0x6a   : > { %2060 = dma.done.wait (%p2531_p12), %s388_s14, 128  }
  0x6b   : > { %2062 = vsyncadd (%p2531_p12), %s388_s14, 4294967168  ;;  %p2532_p6 = scmp.ne.s32.totalorder %s2524_s24, 0 }
  0x6d   : > { %2064 = dma.done.wait (%p2532_p6), [#allocation8], 32  }
  0x6e   : > { %2066 = vsyncadd (%p2532_p6), [#allocation8], 4294967264  ;;  %vm454_vm0 = vcmask 261120   ;;  %v2331_v0 = vld [vmem:[%s391_s27] sm:$0xff]  ;;  %v484_v13 = vld [vmem:[%s2511_s5 + $0x8] sm:$0xff]  ;;  %v2094_v17 = vmov 0.0|0.0  }
  0x6f   : > { %v455_v1 = vsel %vm454_vm0, %v2331_v0, 0.0  ;;  %v483_v12 = vld [vmem:[%s2511_s5] sm:$0xff]  ;;  %v569_v16 = vld [vmem:[%s2513_s7 + $0x8] sm:$0xff]  ;;  %1820 = vmatprep.subr.bf16.mxu0 %v2094_v17  ;;  %1826 = vmatprep.subr.bf16.mxu1 %v2094_v17  ;;  %v485_v19 = vld [vmem:[%s2511_s5 + $0x10] sm:$0xff]  ;;  %vm2095_vm1 = vmmov 0   ;;  %v2096_v25 = vmov 0.0  }
  0x70   : > { %456 = vadd.xlane.f32.xlu0 %v455_v1  ;;  %v1821_v14 = vpack.c.bf16 %v484_v13, %v483_v12  ;;  %v568_v15 = vld [vmem:[%s2513_s7] sm:$0xff]  ;;  %v486_v20 = vld [vmem:[%s2511_s5 + $0x18] sm:$0xff]  ;;  %v570_v22 = vld [vmem:[%s2513_s7 + $0x10] sm:$0xff]  ;;  %1744 = vmatprep.mubr.msk.f32.mxu0 %vm2095_vm1, %v2096_v25  ;;  %vm770_vm2 = vcmask 64512   ;;  %s2097_s26 = smov 120   ;;  %s2098_s11 = smov 104  }
  0x71   : > { %v1827_v18 = vpack.c.bf16 %v569_v16, %v568_v15  ;;  %v1824_v21 = vpack.c.bf16 %v486_v20, %v485_v19  ;;  %v571_v23 = vld [vmem:[%s2513_s7 + $0x18] sm:$0xff]  ;;  %1755 = vmatprep.mubr.msk.f32.mxu1 %vm2095_vm1, %v2096_v25  ;;  %v1674_v33 = vld [vmem:[#allocation7] ss:$0 sm:$0xff]  ;;  %v684_v35 = vld [vmem:[%s2509_s3] sm:$0xff]  ;;  %s2099_s16 = smov 112   ;;  %s2100_s27 = smov 8  }
  0x72   : > { %1822 = vmatpush3.bf16.msra.mxu0 %v1821_v14  ;;  %v1830_v24 = vpack.c.bf16 %v571_v23, %v570_v22  ;;  %v685_v36 = vld [vmem:[%s2509_s3 + $0x8] sm:$0xff]  ;;  %v686_v43 = vld [vmem:[%s2509_s3 + $0x10] sm:$0xff]  ;;  %v687_v44 = vld [vmem:[%s2509_s3 + $0x18] sm:$0xff]  ;;  %s2101_s24 = smov 16   ;;  %s2102_s25 = smov 24   ;;  %vm1112_vm3 = vcmask 130112  }
  0x73   : > { %1828 = vmatpush3.bf16.msra.mxu1 %v1827_v18  ;;  %1823 = vmatprep.subr.bf16.mxu0 %v2094_v17  ;;  %v1675_v37 = vld [vmem:[#allocation9] ss:$0 sm:$0xff]  ;;  %v1833_v40 = vpack.c.bf16 %v685_v36, %v684_v35  ;;  %v1836_v45 = vpack.c.bf16 %v687_v44, %v686_v43  ;;  %v1676_v48 = vld [vmem:[%s2512_s6] ss:$0 sm:$0xff]  ;;  %vm1290_vm4 = vcmask 195712   ;;  %vm1468_vm5 = vcmask 261312  }
  0x74   : > { %657 = vadd.xlane.f32.xlu0 %v455_v1  ;;  %1829 = vmatprep.subr.bf16.mxu1 %v2094_v17  ;;  %v1678_v49 = vld [vmem:[%s2514_s8] ss:$0 sm:$0xff]  ;;  %p440_p7 = scmp.lt.s32.totalorder %s2081_s20, 1  ;;  %s2533_s12 = sld [smem:[#allocation13_spill]] }
  0x75   : > { %v1682_v56 = vld [vmem:[%s2510_s4] ss:$0 sm:$0xff] }
  0x76   : > { %1825 = vmatpush3.bf16.msra.mxu0 %v1824_v21  ;;  %s2542_s20 = smov (!%p440_p7, %s2081_s20), 1 }
  0x77   : > { %1831 = vmatpush3.bf16.msra.mxu1 %v1830_v24  ;;  %1832 = vmatprep.subr.bf16.mxu0 %v2094_v17 }
  0x78   : > { %1769 = vmatprep.subr.mxu1 %v2096_v25 }
  0xfd   : > { %v457_v2 = vpop.xlane.xlu0 %456 }
  0xfe   : > { %v459_v3 = vmul.f32 0.03125, %v457_v2 }
 0x100   : > { %v460_v4 = vsub.f32 %v2331_v0, %v459_v3 }
 0x101   : > { %v658_v5 = vpop.xlane.xlu0 %657 }
 0x102   : > { %v660_v6 = vmul.f32 0.03125, %v658_v5  ;;  %v461_v7 = vmul.f32 %v460_v4, %v460_v4 }
 0x104   : > { %v661_v8 = vsub.f32 %v2331_v0, %v660_v6  ;;  %v462_v9 = vsel %vm454_vm0, %v461_v7, 0.0 }
 0x105   : > { %463 = vadd.xlane.f32.xlu1 %v462_v9 }
 0x106   : > { %v662_v10 = vmul.f32 %v661_v8, %v661_v8 }
 0x108   : > { %v663_v11 = vsel %vm454_vm0, %v662_v10, 0.0 }
 0x109   : > { %664 = vadd.xlane.f32.xlu1 %v663_v11 }
 0x192   : > { %v464_v26 = vpop.xlane.xlu1 %463 }
 0x193   : > { %v465_v27 = vmul.f32 0.03125, %v464_v26 }
 0x195   : > { %v466_v28 = vadd.f32 1e-05, %v465_v27 }
 0x196   : > { %v665_v29 = vpop.xlane.xlu1 %664 }
 0x197   : > { %1929 = vrsqrt.f32 %v466_v28  ;;  %v666_v30 = vmul.f32 0.03125, %v665_v29 }
 0x199   : > { %v667_v31 = vadd.f32 1e-05, %v666_v30 }
 0x19b   : > { %1931 = vrsqrt.f32 %v667_v31 }
 0x1a1   : > { %v1930_v32 = vpop.eup %1929 }
 0x1a2   : > { %v468_v34 = vmul.f32 %v1930_v32, %v460_v4 }
 0x1a4   : > { %v475_v38 = vmul.f32 %v1674_v33, %v468_v34 }
 0x1a5   : > { %v1932_v39 = vpop.eup %1931 }
 0x1a6   : > { %v669_v41 = vmul.f32 %v1932_v39, %v661_v8  ;;  %v482_v42 = vadd.f32 %v1675_v37, %v475_v38 }
 0x1a8   : > { %1745 = vmatmul.mubr.msk.f32.vlgmr.msra.gmra.mrb[0].mxu0 %vm454_vm0, %v482_v42  ;;  %1756 = vmatmul.mubr.msk.f32.vlgmr.msra.gmra.mrb[0].mxu1 %vm454_vm0, %v482_v42  ;;  %v676_v46 = vmul.f32 %v1674_v33, %v669_v41 }
 0x1a9   : > { %1834 = vmatpush3.bf16.msra.mxu0 %v1833_v40  ;;  %1766 = vmatprep.mubr.msk.f32.mxu0 %vm2095_vm1, %v2096_v25 }
 0x1aa   : > { %1835 = vmatprep.subr.bf16.mxu0 %v2094_v17  ;;  %1771 = vmatprep.mubr.msk.f32.mxu1 %vm2095_vm1, %v2096_v25  ;;  %v683_v47 = vadd.f32 %v1675_v37, %v676_v46 }
 0x1ad   : > { %1837 = vmatpush3.bf16.msra.mxu0 %v1836_v45 }
 0x1ae   : > { %1789 = vmatprep.subr.mxu0 %v2096_v25 }
 0x1b0   : > { %1767 = vmatmul.mubr.msk.f32.vlgmr.msra.gmra.mrb[2].mxu0 %vm454_vm0, %v683_v47 }
 0x1b1   : > { %1791 = vmatprep.mubr.msk.f32.mxu0 %vm2095_vm1, %v2096_v25 }
 0x27b   : > { %v563_v50 = vpop.f32.mrb[0].mxu0  ;;  %v645_v51 = vpop.f32.mrb[0].mxu1 }
 0x27c   : > { %v564_v52 = vadd.f32 %v1676_v48, %v563_v50  ;;  %v646_v53 = vadd.f32 %v1678_v49, %v645_v51  ;;  %v1746_v54 = vpop.f32.mrb[1].mxu0  ;;  %v1757_v55 = vpop.f32.mrb[1].mxu1 }
 0x27e   : > { %567 = vst.msk [vmem:[#allocation2] sm:$0xff] %vm454_vm0, %v564_v52  ;;  %649 = vst.msk [vmem:[#allocation3] sm:$0xff] %vm454_vm0, %v646_v53 }
 0x283   : > { %v764_v57 = vpop.f32.mrb[2].mxu0 }
 0x284   : > { %v765_v58 = vadd.f32 %v1682_v56, %v764_v57  ;;  %v1768_v59 = vpop.f32.mrb[3].mxu0 }
 0x285   : > { %v769_v60 = vld [vmem:[#allocation2] sm:$0xff]  ;;  %v2410_v62 = vld [vmem:[#allocation3] sm:$0xff] }
 0x286   : > { %1770 = vmatpush3.xpose.msk.msra.mxu1 %vm770_vm2, %v769_v60  ;;  %v768_v61 = vmul.f32 0.35355338, %v765_v58 }
 0x287   : > { %1774 = vmatprep.subr.mxu1 %v2096_v25 }
 0x289   : > { %1772 = vmatmul.mubr.msk.f32.vlgmr.msra.gmra.mrb[2].mxu1 %vm770_vm2, %v768_v61 }
 0x28a   : > { %1775 = vmatpush3.msra.mxu1 %v2410_v62  ;;  %1776 = vmatprep.mubr.msk.f32.mxu1 %vm2095_vm1, %v2096_v25 }
 0x28b   : > { %1779 = vmatprep.subr.mxu1 %v2096_v25 }
 0x35c   : > { %v843_v63 = vpop.f32.mrb[2].mxu1 }
 0x35d   : > { %v1773_v1 = vpop.f32.mrb[3].mxu1  ;;  %v847_v2 = vsel %vm770_vm2, %v843_v63, -inf }
 0x35e   : > { %848 = vmax.xlane.f32.xlu0 %v847_v2 }
 0x374   : > { %940 = vrot.lane.b32.xlu0 %v769_v60, %s2097_s26 }
 0x378   : > { %1296 = vrot.lane.b32.xlu0 %v769_v60, %s2098_s11 }
 0x3eb   : > { %v849_v3 = vpop.xlane.xlu0 %848 }
 0x3ec   : > { %v850_v4 = vsub.f32 %v843_v63, %v849_v3 }
 0x3ee   : > { %v851_v5 = vmul.f32 1.442695, %v850_v4 }
 0x3ef   : > { %v941_v10 = vpop.permute.xlu0 %940 }
 0x3f0   : > { %1933 = vpow2.f32 %v851_v5 }
 0x3f3   : > { %v1297_v15 = vpop.permute.xlu0 %1296 }
 0x3fa   : > { %v1934_v6 = vpop.eup %1933 }
 0x3fb   : > { %v853_v7 = vsel %vm770_vm2, %v1934_v6, 0.0 }
 0x3fc   : > { %854 = vadd.xlane.f32.xlu1 %v853_v7  ;;  %v1472_v7 = vld [vmem:[%s2515_s9 + $0x8] sm:$0xff] }
 0x40d   : > { %937 = vrot.lane.b32.xlu1 %v768_v61, %s2097_s26 }
 0x411   : > { %1118 = vrot.lane.b32.xlu1 %v769_v60, %s2099_s16 }
 0x415   : > { %1115 = vrot.lane.b32.xlu1 %v768_v61, %s2099_s16 }
 0x419   : > { %1293 = vrot.lane.b32.xlu1 %v768_v61, %s2098_s11 }
 0x489   : > { %v855_v8 = vpop.xlane.xlu1 %854 }
 0x48a   : > { %1935 = vrcp.f32 %v855_v8 }
 0x48d   : > { %v938_v9 = vpop.permute.xlu1 %937 }
 0x491   : > { %v1119_v11 = vpop.permute.xlu1 %1118 }
 0x492   : > { %1790 = vmatpush3.xpose.msk.msra.mxu0 %vm770_vm2, %v1119_v11 }
 0x493   : > { %1799 = vmatprep.subr.mxu0 %v2096_v25 }
 0x494   : > { %v1936_v12 = vpop.eup %1935 }
 0x495   : > { %v857_v13 = vmul.f32 %v1936_v12, %v855_v8  ;;  %v1116_v14 = vpop.permute.xlu1 %1115 }
 0x496   : > { %1792 = vmatmul.mubr.msk.f32.vlgmr.msra.gmra.mrb[4].mxu0 %vm770_vm2, %v1116_v14 }
 0x497   : > { %v858_v16 = vsub.f32 2.0, %v857_v13  ;;  %1800 = vmatpush3.xpose.msk.msra.mxu0 %vm770_vm2, %v1297_v15  ;;  %1801 = vmatprep.mubr.msk.f32.mxu0 %vm2095_vm1, %v2096_v25 }
 0x498   : > { %1838 = vmatprep.subr.bf16.mxu0 %v2094_v17 }
 0x499   : > { %v859_v18 = vmul.f32 %v1936_v12, %v858_v16  ;;  %v1294_v19 = vpop.permute.xlu1 %1293 }
 0x49a   : > { %1802 = vmatmul.mubr.msk.f32.vlgmr.msra.gmra.mrb[6].mxu0 %vm770_vm2, %v1294_v19 }
 0x49b   : > { %v860_v20 = vmul.f32 %v1934_v6, %v859_v18  ;;  %1817 = vmatprep.mubr.msk.f32.mxu0 %vm2095_vm1, %v2096_v25  ;;  %v1471_v6 = vld [vmem:[%s2515_s9] sm:$0xff] }
 0x49c   : > { %v1839_v8 = vpack.c.bf16 %v1472_v7, %v1471_v6 }
 0x49d   : > { %1777 = vmatmul.mubr.msk.f32.vlgmr.msra.gmra.mrb[4].mxu1 %vm770_vm2, %v860_v20 }
 0x49e   : > { %1780 = vmatpush3.xpose.msk.msra.mxu1 %vm770_vm2, %v941_v10  ;;  %1781 = vmatprep.mubr.msk.f32.mxu1 %vm2095_vm1, %v2096_v25 }
 0x49f   : > { %1784 = vmatprep.subr.mxu1 %v2096_v25  ;;  %1840 = vmatpush3.bf16.msra.mxu0 %v1839_v8 }
 0x4a0   : > { %1841 = vmatprep.subr.bf16.mxu0 %v2094_v17 }
 0x4a1   : > { %1782 = vmatmul.mubr.msk.f32.vlgmr.msra.gmra.mrb[6].mxu1 %vm770_vm2, %v938_v9  ;;  %v1473_v9 = vld [vmem:[%s2515_s9 + $0x10] sm:$0xff] }
 0x4a2   : > { %1786 = vmatprep.mubr.msk.f32.mxu1 %vm2095_vm1, %v2096_v25 }
 0x569   : > { %v1190_v21 = vpop.f32.mrb[4].mxu0 }
 0x56a   : > { %v1793_v22 = vpop.f32.mrb[5].mxu0  ;;  %v1194_v23 = vsel %vm770_vm2, %v1190_v21, -inf }
 0x56b   : > { %1195 = vmax.xlane.f32.xlu1 %v1194_v23 }
 0x56d   : > { %v1368_v24 = vpop.f32.mrb[6].mxu0 }
 0x56e   : > { %v1803_v26 = vpop.f32.mrb[7].mxu0  ;;  %v1372_v32 = vsel %vm770_vm2, %v1368_v24, -inf }
 0x570   : > { %v931_v27 = vpop.f32.mrb[4].mxu1 }
 0x571   : > { %935 = vst.msk [vmem:[#allocation4] sm:$0xff] %vm770_vm2, %v931_v27  ;;  %v1778_v28 = vpop.f32.mrb[5].mxu1 }
 0x574   : > { %v1012_v29 = vpop.f32.mrb[6].mxu1 }
 0x575   : > { %v1783_v30 = vpop.f32.mrb[7].mxu1  ;;  %v1016_v31 = vsel %vm770_vm2, %v1012_v29, -inf }
 0x576   : > { %1017 = vmax.xlane.f32.xlu0 %v1016_v31 }
 0x57a   : > { %1373 = vmax.xlane.f32.xlu0 %v1372_v32 }
 0x5f8   : > { %v1196_v33 = vpop.xlane.xlu1 %1195 }
 0x5f9   : > { %v1197_v34 = vsub.f32 %v1190_v21, %v1196_v33  ;;  %v1696_v21 = vld [vmem:[%s2516_s10] ss:$0 sm:$0xff] }
 0x5fb   : > { %v1198_v37 = vmul.f32 1.442695, %v1197_v34 }
 0x603   : > { %v1018_v35 = vpop.xlane.xlu0 %1017 }
 0x604   : > { %v1019_v36 = vsub.f32 %v1012_v29, %v1018_v35 }
 0x606   : > { %v1020_v38 = vmul.f32 1.442695, %v1019_v36 }
 0x607   : > { %v1374_v39 = vpop.xlane.xlu0 %1373 }
 0x608   : > { %1937 = vpow2.f32 %v1020_v38  ;;  %v1375_v40 = vsub.f32 %v1368_v24, %v1374_v39 }
 0x609   : > { %1939 = vpow2.f32 %v1198_v37 }
 0x60a   : > { %v1376_v41 = vmul.f32 1.442695, %v1375_v40 }
 0x60c   : > { %1941 = vpow2.f32 %v1376_v41 }
 0x612   : > { %v1938_v42 = vpop.eup %1937 }
 0x613   : > { %v1022_v43 = vsel %vm770_vm2, %v1938_v42, 0.0  ;;  %v1940_v44 = vpop.eup %1939 }
 0x614   : > { %1023 = vadd.xlane.f32.xlu0 %v1022_v43  ;;  %v1200_v46 = vsel %vm770_vm2, %v1940_v44, 0.0 }
 0x616   : > { %v1942_v45 = vpop.eup %1941 }
 0x617   : > { %v1378_v47 = vsel %vm770_vm2, %v1942_v45, 0.0 }
 0x618   : > { %1201 = vadd.xlane.f32.xlu0 %v1200_v46  ;;  %1379 = vadd.xlane.f32.xlu1 %v1378_v47 }
 0x629   : > { %1210 = vrot.lane.b32.xlu1 %v2410_v62, %s2099_s16  ;;  %s1673_s16 = sshll.u32 %s2542_s20, 3 }
 0x62a   : > { %s446_s29 = scalar_lea.vmem %s2533_s12, %s1673_s16 }
 0x62d   : > { %1388 = vrot.lane.b32.xlu1 %v2410_v62, %s2098_s11 }
 0x62e   : > { %1032 = vrot.lane.b32.xlu0 %v2410_v62, %s2097_s26 }
 0x6a1   : > { %v1024_v48 = vpop.xlane.xlu0 %1023 }
 0x6a2   : > { %1943 = vrcp.f32 %v1024_v48 }
 0x6a5   : > { %v1380_v49 = vpop.xlane.xlu1 %1379  ;;  %v1202_v50 = vpop.xlane.xlu0 %1201 }
 0x6a6   : > { %1945 = vrcp.f32 %v1380_v49 }
 0x6a7   : > { %1947 = vrcp.f32 %v1202_v50 }
 0x6a9   : > { %v1033_v51 = vpop.permute.xlu0 %1032  ;;  %v1211_v63 = vpop.permute.xlu1 %1210 }
 0x6aa   : > { %1785 = vmatpush3.msra.mxu1 %v1033_v51 }
 0x6ab   : > { %1794 = vmatprep.subr.mxu1 %v2096_v25 }
 0x6ac   : > { %v1944_v52 = vpop.eup %1943 }
 0x6ad   : > { %v1026_v53 = vmul.f32 %v1944_v52, %v1024_v48  ;;  %v1389_v4 = vpop.permute.xlu1 %1388 }
 0x6af   : > { %v1027_v54 = vsub.f32 2.0, %v1026_v53 }
 0x6b0   : > { %v1946_v55 = vpop.eup %1945 }
 0x6b1   : > { %v1948_v56 = vpop.eup %1947  ;;  %v1028_v57 = vmul.f32 %v1944_v52, %v1027_v54  ;;  %v1382_v58 = vmul.f32 %v1946_v55, %v1380_v49 }
 0x6b2   : > { %v1204_v59 = vmul.f32 %v1948_v56, %v1202_v50 }
 0x6b3   : > { %v1029_v60 = vmul.f32 %v1938_v42, %v1028_v57  ;;  %v1383_v61 = vsub.f32 2.0, %v1382_v58 }
 0x6b4   : > { %v1205_v62 = vsub.f32 2.0, %v1204_v59 }
 0x6b5   : > { %1787 = vmatmul.mubr.msk.f32.vlgmr.msra.gmra.mrb[8].mxu1 %vm770_vm2, %v1029_v60  ;;  %v1384_v2 = vmul.f32 %v1946_v55, %v1383_v61 }
 0x6b6   : > { %v1206_v1 = vmul.f32 %v1948_v56, %v1205_v62  ;;  %1795 = vmatpush3.msra.mxu1 %v1211_v63  ;;  %1796 = vmatprep.mubr.msk.f32.mxu1 %vm2095_vm1, %v2096_v25 }
 0x6b7   : > { %1804 = vmatprep.subr.mxu1 %v2096_v25  ;;  %v1385_v5 = vmul.f32 %v1942_v45, %v1384_v2 }
 0x6b8   : > { %v1207_v3 = vmul.f32 %v1940_v44, %v1206_v1 }
 0x6ba   : > { %1797 = vmatmul.mubr.msk.f32.vlgmr.msra.gmra.mrb[10].mxu1 %vm770_vm2, %v1207_v3 }
 0x6bb   : > { %1805 = vmatpush3.msra.mxu1 %v1389_v4  ;;  %1806 = vmatprep.mubr.msk.f32.mxu1 %vm2095_vm1, %v2096_v25  ;;  %v1474_v25 = vld [vmem:[%s2515_s9 + $0x18] sm:$0xff] }
 0x6bc   : > { %v1842_v10 = vpack.c.bf16 %v1474_v25, %v1473_v9 }
 0x6be   : > { %1807 = vmatmul.mubr.msk.f32.vlgmr.msra.gmra.mrb[12].mxu1 %vm770_vm2, %v1385_v5  ;;  %1843 = vmatpush3.bf16.msra.mxu0 %v1842_v10 }
 0x788   : > { %v1104_v11 = vpop.f32.mrb[8].mxu1 }
 0x789   : > { %1109 = vrot.lane.b32.xlu1 %v1104_v11, %s2100_s27  ;;  %v1788_v12 = vpop.f32.mrb[9].mxu1 }
 0x78d   : > { %v1282_v13 = vpop.f32.mrb[10].mxu1 }
 0x78e   : > { %1287 = vrot.lane.b32.xlu0 %v1282_v13, %s2101_s24  ;;  %v1798_v14 = vpop.f32.mrb[11].mxu1 }
 0x791   : > { %v1460_v15 = vpop.f32.mrb[12].mxu1 }
 0x792   : > { %1465 = vrot.lane.b32.xlu1 %v1460_v15, %s2102_s25  ;;  %v1808_v16 = vpop.f32.mrb[13].mxu1 }
 0x7fb   : > { %v1110_v18 = vpop.permute.xlu1 %1109 }
 0x7fc   : > { %1113 = vst.msk [vmem:[#allocation4] sm:$0xff] %vm1112_vm3, %v1110_v18 }
 0x800   : > { %v1288_v19 = vpop.permute.xlu0 %1287 }
 0x801   : > { %1291 = vst.msk [vmem:[#allocation4] sm:$0xff] %vm1290_vm4, %v1288_v19 }
 0x804   : > { %v1466_v17 = vpop.permute.xlu1 %1465 }
 0x805   : > { %1469 = vst.msk [vmem:[#allocation4] sm:$0xff] %vm1468_vm5, %v1466_v17 }
 0x80c   : > { %v1470_v20 = vld [vmem:[#allocation4] sm:$0xff] }
 0x80d   : > { %1818 = vmatmul.mubr.msk.f32.vlgmr.msra.gmra.mrb[8].mxu0 %vm454_vm0, %v1470_v20 }
 0x8e0   : > { %v1551_v22 = vpop.f32.mrb[8].mxu0 }
 0x8e1   : > { %v1552_v23 = vadd.f32 %v1696_v21, %v1551_v22  ;;  %v1819_v24 = vpop.f32.mrb[9].mxu0 }
 0x8e3   : > { %v1555_v26 = vadd.f32 %v1552_v23, %v2331_v0 }
 0x8e5   : > { %1556 = vst.msk [vmem:[%s446_s29] sm:$0xff] %vm454_vm0, %v1555_v26 }
 0x8e6 PF: > { %s25_s22 = sadd.s32 1, %s2089_s22   ;;  %s2534_s17 = smov %s2073_s18 }
 0x8e7   : > { %p22_p9 = scmp.ge.s32.totalorder %s25_s22, 4   ;;  %s2535_s18 = smov %s2077_s19 }
 0x8e8   : > { %s2536_s19 = smov %s2280_s13  ;;  %s2537_s20 = smov %s2085_s21 }
 0x8e9   : > { %s2538_s21 = smov %s2540_s15  ;;  %24 = sbr.rel (!%p22_p9) target bundleno = 8 (0x8), region = 117 }
 0x8f0   :  { %1582 = vsyncpa [#allocation6], 1 }
 0x8f1   :  { %1584 = vsyncpa [#allocation6 + $0x1], 1 }
 0x8f2   :  { %1585 = vsyncpa [#allocation8], 1 }

// kernel: decoder_layer.4
= control target key start
LH: loop header
LB: loop body
LE: loop exit
PB: predicated region body
PF: predicated region fallthrough
CT: control target
= control target key end

     0   :  { %s1936_s21 = smov 0   ;;  %s1938_s22 = smov 0   ;;  %s2133_s0 = inlined_call_operand.vmem [shape: f32[2,8,32], index: 0, kind: input, shape index: {}]   ;;  %s2134_s1 = inlined_call_operand.vmem [shape: f32[2,8,32], index: 1, kind: input, shape index: {}]   ;;  %s2135_s2 = inlined_call_operand.vmem [shape: f32[1,32], index: 2, kind: input, shape index: {}]   ;;  %s2136_s3 = inlined_call_operand.vmem [shape: f32[1,32], index: 3, kind: input, shape index: {}]   ;;  %s2137_s4 = inlined_call_operand.vmem [shape: f32[32,32], index: 4, kind: input, shape index: {}]   ;;  %s2138_s5 = inlined_call_operand.vmem [shape: f32[1,32], index: 5, kind: input, shape index: {}]   ;;  %s2139_s6 = inlined_call_operand.vmem [shape: f32[32,32], index: 6, kind: input, shape index: {}]   ;;  %s2140_s7 = inlined_call_operand.vmem [shape: f32[1,32], index: 7, kind: input, shape index: {}]   ;;  %s2141_s8 = inlined_call_operand.vmem [shape: f32[32,32], index: 8, kind: input, shape index: {}]   ;;  %s2142_s9 = inlined_call_operand.vmem [shape: f32[1,32], index: 9, kind: input, shape index: {}]   ;;  %s2143_s10 = inlined_call_operand.vmem [shape: f32[32,32], index: 10, kind: input, shape index: {}]   ;;  %s2144_s11 = inlined_call_operand.vmem [shape: f32[1,32], index: 11, kind: input, shape index: {}]   ;;  %s2145_s12 = inlined_call_operand.vmem [shape: f32[2,8,32], index: 12, kind: output, shape index: {}]  }
   0x1   :  { %s1940_s23 = smov 0  }
   0x2 LB: > { %s34_s24 = sadd.s32 1, %s1856_s22  ;;  %p1615_p0 = scmp.ge.s32.totalorder %s1860_s23, 1  ;;  %s1860_s23 = sphi %s1940_s23, %s22_s23   ;;  %s1856_s22 = sphi %s1938_s22, %s2147_s22   ;;  %s1852_s21 = sphi %s1936_s21, %s2146_s21  }
   0x3   : > { %p36_p1 = scmp.ge.s32.totalorder %s34_s24, 2  ;;  %p384_p2 = scmp.lt.s32.totalorder %s1860_s23, 3 }
   0x5   : > { %s2149_s24 = smov (%p36_p1, %s34_s24), 0  ;;  %p385_p3 = pnand %p1615_p0, %p384_p2 }
   0x6   : > { %p431_p4 = scmp.lt.s32.totalorder (!%p385_p3), %s1852_s21, 1  ;;  %vm462_vm0 = vcmask (!%p385_p3), 261120   ;;  %v1862_v2 = vmov (!%p385_p3), 0.0|0.0   ;;  %v451_v8 = vld [vmem:[%s2139_s6] sm:$0xff] (!%p385_p3)  ;;  %v452_v9 = vld [vmem:[%s2139_s6 + $0x8] sm:$0xff] (!%p385_p3)  ;;  %v453_v11 = vld [vmem:[%s2139_s6 + $0x10] sm:$0xff] (!%p385_p3) }
   0x7   : > { %388 = sbr.rel (%p385_p3) target bundleno = 2176 (0x880), region = 68  ;;  %1763 = vmatprep.subr.bf16.mxu0 (!%p385_p3), %v1862_v2  ;;  %1769 = vmatprep.subr.bf16.mxu1 (!%p385_p3), %v1862_v2  ;;  %v1764_v10 = vpack.c.bf16 (!%p385_p3), %v452_v9, %v451_v8  ;;  %v454_v12 = vld [vmem:[%s2139_s6 + $0x18] sm:$0xff] (!%p385_p3)  ;;  %vm1863_vm1 = vmmov (!%p385_p3), 0   ;;  %v1864_v14 = vmov (!%p385_p3), 0.0   ;;  %v653_v16 = vld [vmem:[%s2137_s4] sm:$0xff] (!%p385_p3)  ;;  %v654_v17 = vld [vmem:[%s2137_s4 + $0x8] sm:$0xff] (!%p385_p3) }
   0x8   : > { %v1767_v13 = vpack.c.bf16 (!%p385_p3), %v454_v12, %v453_v11  ;;  %1687 = vmatprep.mubr.msk.f32.mxu0 (!%p385_p3), %vm1863_vm1, %v1864_v14  ;;  %1698 = vmatprep.mubr.msk.f32.mxu1 (!%p385_p3), %vm1863_vm1, %v1864_v14  ;;  %v1776_v18 = vpack.c.bf16 (!%p385_p3), %v654_v17, %v653_v16  ;;  %v655_v19 = vld [vmem:[%s2137_s4 + $0x10] sm:$0xff] (!%p385_p3)  ;;  %v656_v20 = vld [vmem:[%s2137_s4 + $0x18] sm:$0xff] (!%p385_p3)  ;;  %v537_v22 = vld [vmem:[%s2141_s8] sm:$0xff] (!%p385_p3)  ;;  %s1865_s16 = smov (!%p385_p3), 120   ;;  %vm739_vm2 = vcmask (!%p385_p3), 64512   ;;  %s1866_s17 = smov (!%p385_p3), 104  }
   0x9   : > { %1765 = vmatpush3.bf16.msra.mxu0 (!%p385_p3), %v1764_v10  ;;  %v1779_v21 = vpack.c.bf16 (!%p385_p3), %v656_v20, %v655_v19  ;;  %v538_v23 = vld [vmem:[%s2141_s8 + $0x8] sm:$0xff] (!%p385_p3)  ;;  %v539_v24 = vld [vmem:[%s2141_s8 + $0x10] sm:$0xff] (!%p385_p3)  ;;  %v540_v26 = vld [vmem:[%s2141_s8 + $0x18] sm:$0xff] (!%p385_p3)  ;;  %s1867_s26 = smov (!%p385_p3), 112   ;;  %s1869_s18 = smov (!%p385_p3), 16   ;;  %vm1081_vm3 = vcmask (!%p385_p3), 130112  }
   0xa   : > { %1766 = vmatprep.subr.bf16.mxu0 (!%p385_p3), %v1862_v2  ;;  %v1770_v25 = vpack.c.bf16 (!%p385_p3), %v538_v23, %v537_v22  ;;  %v1773_v27 = vpack.c.bf16 (!%p385_p3), %v540_v26, %v539_v24  ;;  %v1623_v32 = vld [vmem:[%s2135_s2] ss:$0 sm:$0xff] (!%p385_p3)  ;;  %s1870_s19 = smov (!%p385_p3), 24   ;;  %vm1259_vm4 = vcmask (!%p385_p3), 195712   ;;  %vm1437_vm5 = vcmask (!%p385_p3), 261312  }
   0xb   : > { %v1624_v34 = vld [vmem:[%s2136_s3] ss:$0 sm:$0xff] (!%p385_p3) }
   0xc   : > { %1771 = vmatpush3.bf16.msra.mxu1 (!%p385_p3), %v1770_v25  ;;  %v1619_v37 = vld [vmem:[%s2140_s7] ss:$0 sm:$0xff] (!%p385_p3) }
   0xd   : > { %1768 = vmatpush3.bf16.msra.mxu0 (!%p385_p3), %v1767_v13  ;;  %1772 = vmatprep.subr.bf16.mxu1 (!%p385_p3), %v1862_v2  ;;  %v1621_v42 = vld [vmem:[%s2142_s9] ss:$0 sm:$0xff] (!%p385_p3) }
   0xe   : > { %s2151_s21 = smov (!%p431_p4, %s1852_s21), 1  ;;  %1775 = vmatprep.subr.bf16.mxu0 %v1862_v2  ;;  %v1625_v46 = vld [vmem:[%s2138_s5] ss:$0 sm:$0xff] }
   0xf   : > { %s1954_s25 = sshll.u32 %s2151_s21, 3 }
  0x10   : > { %s434_s28 = scalar_lea.vmem %s2133_s0, %s1954_s25  ;;  %s438_s21 = scalar_lea.vmem %s2134_s1, %s1954_s25  ;;  %1774 = vmatpush3.bf16.msra.mxu1 %v1773_v27 }
  0x11   : > { %v1960_v0 = vld [vmem:[%s434_s28] sm:$0xff]  ;;  %1712 = vmatprep.subr.mxu1 %v1864_v14  ;;  %s445_s28 = scalar_lea.vmem %s2145_s12, %s1954_s25 }
  0x12   : > { %v625_v1 = vsel %vm462_vm0, %v1960_v0, 0.0  ;;  %v450_v15 = vld [vmem:[%s438_s21] sm:$0xff] }
  0x13   : > { %626 = vadd.xlane.f32.xlu0 %v625_v1  ;;  %1688 = vmatmul.mubr.msk.f32.vlgmr.msra.gmra.mrb[0].mxu0 %vm462_vm0, %v450_v15 }
  0x14   : > { %1709 = vmatprep.mubr.msk.f32.mxu0 %vm1863_vm1, %v1864_v14  ;;  %1777 = vmatpush3.bf16.msra.mxu0 %v1776_v18 }
  0x15   : > { %1778 = vmatprep.subr.bf16.mxu0 %v1862_v2  ;;  %1699 = vmatmul.mubr.msk.f32.vlgmr.msra.gmra.mrb[0].mxu1 %vm462_vm0, %v450_v15 }
  0x16   : > { %1714 = vmatprep.mubr.msk.f32.mxu1 %vm1863_vm1, %v1864_v14 }
  0x18   : > { %1780 = vmatpush3.bf16.msra.mxu0 %v1779_v21 }
  0x19   : > { %1732 = vmatprep.subr.mxu0 %v1864_v14 }
  0xa0   : > { %v627_v3 = vpop.xlane.xlu0 %626 }
  0xa1   : > { %v629_v4 = vmul.f32 0.03125, %v627_v3 }
  0xa3   : > { %v630_v5 = vsub.f32 %v1960_v0, %v629_v4 }
  0xa5   : > { %v631_v6 = vmul.f32 %v630_v5, %v630_v5 }
  0xa7   : > { %v632_v7 = vsel %vm462_vm0, %v631_v6, 0.0 }
  0xa8   : > { %633 = vadd.xlane.f32.xlu0 %v632_v7 }
  0xe6   : > { %v532_v38 = vpop.f32.mrb[0].mxu0 }
  0xe7   : > { %v533_v39 = vadd.f32 %v1619_v37, %v532_v38  ;;  %v1689_v40 = vpop.f32.mrb[1].mxu0 }
  0xe8   : > { %v614_v43 = vpop.f32.mrb[0].mxu1 }
  0xe9   : > { %536 = vst.msk [vmem:[#allocation2] sm:$0xff] %vm462_vm0, %v533_v39  ;;  %v615_v44 = vadd.f32 %v1621_v42, %v614_v43  ;;  %v1700_v45 = vpop.f32.mrb[1].mxu1 }
  0xeb   : > { %618 = vst.msk [vmem:[#allocation3] sm:$0xff] %vm462_vm0, %v615_v44 }
  0xf0   : > { %v905_v41 = vld [vmem:[#allocation2] sm:$0xff] }
  0xf1   : > { %909 = vrot.lane.b32.xlu0 %v905_v41, %s1865_s16  ;;  %1713 = vmatpush3.xpose.msk.msra.mxu1 %vm739_vm2, %v905_v41 }
  0xf2   : > { %1717 = vmatprep.subr.mxu1 %v1864_v14  ;;  %v2051_v51 = vld [vmem:[#allocation3] sm:$0xff] }
  0xf5   : > { %1265 = vrot.lane.b32.xlu0 %v905_v41, %s1866_s17 }
 0x135   : > { %v634_v28 = vpop.xlane.xlu0 %633 }
 0x136   : > { %v635_v29 = vmul.f32 0.03125, %v634_v28 }
 0x138   : > { %v636_v30 = vadd.f32 1e-05, %v635_v29 }
 0x13a   : > { %1820 = vrsqrt.f32 %v636_v30 }
 0x144   : > { %v1821_v31 = vpop.eup %1820 }
 0x145   : > { %v638_v33 = vmul.f32 %v1821_v31, %v630_v5 }
 0x147   : > { %v645_v35 = vmul.f32 %v1623_v32, %v638_v33 }
 0x149   : > { %v652_v36 = vadd.f32 %v1624_v34, %v645_v35 }
 0x14b   : > { %1710 = vmatmul.mubr.msk.f32.vlgmr.msra.gmra.mrb[2].mxu0 %vm462_vm0, %v652_v36 }
 0x14c   : > { %1734 = vmatprep.mubr.msk.f32.mxu0 %vm1863_vm1, %v1864_v14 }
 0x163   : > { %v910_v62 = vpop.permute.xlu0 %909 }
 0x167   : > { %v1266_v5 = vpop.permute.xlu0 %1265 }
 0x21e   : > { %v733_v47 = vpop.f32.mrb[2].mxu0 }
 0x21f   : > { %v734_v48 = vadd.f32 %v1625_v46, %v733_v47  ;;  %v1711_v49 = vpop.f32.mrb[3].mxu0 }
 0x221   : > { %v737_v50 = vmul.f32 0.35355338, %v734_v48 }
 0x223   : > { %1715 = vmatmul.mubr.msk.f32.vlgmr.msra.gmra.mrb[2].mxu1 %vm739_vm2, %v737_v50 }
 0x224   : > { %1719 = vmatprep.mubr.msk.f32.mxu1 %vm1863_vm1, %v1864_v14  ;;  %1718 = vmatpush3.msra.mxu1 %v2051_v51 }
 0x225   : > { %1722 = vmatprep.subr.mxu1 %v1864_v14 }
 0x2f6   : > { %v812_v52 = vpop.f32.mrb[2].mxu1 }
 0x2f7   : > { %v1716_v53 = vpop.f32.mrb[3].mxu1  ;;  %v816_v54 = vsel %vm739_vm2, %v812_v52, -inf }
 0x2f8   : > { %817 = vmax.xlane.f32.xlu1 %v816_v54 }
 0x385   : > { %v818_v55 = vpop.xlane.xlu1 %817 }
 0x386   : > { %v819_v56 = vsub.f32 %v812_v52, %v818_v55 }
 0x388   : > { %v820_v57 = vmul.f32 1.442695, %v819_v56 }
 0x38a   : > { %1822 = vpow2.f32 %v820_v57 }
 0x394   : > { %v1823_v58 = vpop.eup %1822 }
 0x395   : > { %v822_v59 = vsel %vm739_vm2, %v1823_v58, 0.0 }
 0x396   : > { %823 = vadd.xlane.f32.xlu1 %v822_v59  ;;  %v1441_v59 = vld [vmem:[%s2143_s10 + $0x8] sm:$0xff] }
 0x3a7   : > { %906 = vrot.lane.b32.xlu1 %v737_v50, %s1865_s16 }
 0x3ab   : > { %1087 = vrot.lane.b32.xlu1 %v905_v41, %s1867_s26 }
 0x3af   : > { %1084 = vrot.lane.b32.xlu1 %v737_v50, %s1867_s26 }
 0x3b3   : > { %1262 = vrot.lane.b32.xlu1 %v737_v50, %s1866_s17 }
 0x423   : > { %v824_v60 = vpop.xlane.xlu1 %823 }
 0x424   : > { %1824 = vrcp.f32 %v824_v60 }
 0x427   : > { %v907_v61 = vpop.permute.xlu1 %906 }
 0x42b   : > { %v1088_v63 = vpop.permute.xlu1 %1087 }
 0x42c   : > { %1733 = vmatpush3.xpose.msk.msra.mxu0 %vm739_vm2, %v1088_v63 }
 0x42d   : > { %1742 = vmatprep.subr.mxu0 %v1864_v14 }
 0x42e   : > { %v1825_v1 = vpop.eup %1824 }
 0x42f   : > { %v826_v3 = vmul.f32 %v1825_v1, %v824_v60  ;;  %v1085_v4 = vpop.permute.xlu1 %1084 }
 0x430   : > { %1735 = vmatmul.mubr.msk.f32.vlgmr.msra.gmra.mrb[4].mxu0 %vm739_vm2, %v1085_v4 }
 0x431   : > { %v827_v6 = vsub.f32 2.0, %v826_v3  ;;  %1743 = vmatpush3.xpose.msk.msra.mxu0 %vm739_vm2, %v1266_v5  ;;  %1744 = vmatprep.mubr.msk.f32.mxu0 %vm1863_vm1, %v1864_v14 }
 0x432   : > { %1781 = vmatprep.subr.bf16.mxu0 %v1862_v2 }
 0x433   : > { %v828_v7 = vmul.f32 %v1825_v1, %v827_v6  ;;  %v1263_v8 = vpop.permute.xlu1 %1262 }
 0x434   : > { %1745 = vmatmul.mubr.msk.f32.vlgmr.msra.gmra.mrb[6].mxu0 %vm739_vm2, %v1263_v8 }
 0x435   : > { %v829_v9 = vmul.f32 %v1823_v58, %v828_v7  ;;  %1760 = vmatprep.mubr.msk.f32.mxu0 %vm1863_vm1, %v1864_v14  ;;  %v1440_v58 = vld [vmem:[%s2143_s10] sm:$0xff] }
 0x436   : > { %v1782_v60 = vpack.c.bf16 %v1441_v59, %v1440_v58 }
 0x437   : > { %1720 = vmatmul.mubr.msk.f32.vlgmr.msra.gmra.mrb[4].mxu1 %vm739_vm2, %v829_v9 }
 0x438   : > { %1723 = vmatpush3.xpose.msk.msra.mxu1 %vm739_vm2, %v910_v62  ;;  %1724 = vmatprep.mubr.msk.f32.mxu1 %vm1863_vm1, %v1864_v14 }
 0x439   : > { %1727 = vmatprep.subr.mxu1 %v1864_v14  ;;  %1783 = vmatpush3.bf16.msra.mxu0 %v1782_v60 }
 0x43a   : > { %1784 = vmatprep.subr.bf16.mxu0 %v1862_v2 }
 0x43b   : > { %1725 = vmatmul.mubr.msk.f32.vlgmr.msra.gmra.mrb[6].mxu1 %vm739_vm2, %v907_v61  ;;  %v1442_v61 = vld [vmem:[%s2143_s10 + $0x10] sm:$0xff] }
 0x43c   : > { %1729 = vmatprep.mubr.msk.f32.mxu1 %vm1863_vm1, %v1864_v14 }
 0x503   : > { %v1159_v10 = vpop.f32.mrb[4].mxu0 }
 0x504   : > { %v1736_v11 = vpop.f32.mrb[5].mxu0  ;;  %v1163_v12 = vsel %vm739_vm2, %v1159_v10, -inf }
 0x505   : > { %1164 = vmax.xlane.f32.xlu1 %v1163_v12 }
 0x507   : > { %v1337_v13 = vpop.f32.mrb[6].mxu0 }
 0x508   : > { %v1746_v15 = vpop.f32.mrb[7].mxu0  ;;  %v1341_v21 = vsel %vm739_vm2, %v1337_v13, -inf }
 0x50a   : > { %v900_v16 = vpop.f32.mrb[4].mxu1 }
 0x50b   : > { %904 = vst.msk [vmem:[#allocation4] sm:$0xff] %vm739_vm2, %v900_v16  ;;  %v1721_v17 = vpop.f32.mrb[5].mxu1 }
 0x50e   : > { %v981_v18 = vpop.f32.mrb[6].mxu1 }
 0x50f   : > { %v1726_v19 = vpop.f32.mrb[7].mxu1  ;;  %v985_v20 = vsel %vm739_vm2, %v981_v18, -inf }
 0x510   : > { %986 = vmax.xlane.f32.xlu0 %v985_v20 }
 0x514   : > { %1342 = vmax.xlane.f32.xlu0 %v1341_v21 }
 0x592   : > { %v1165_v22 = vpop.xlane.xlu1 %1164 }
 0x593   : > { %v1166_v23 = vsub.f32 %v1159_v10, %v1165_v22  ;;  %v1639_v10 = vld [vmem:[%s2144_s11] ss:$0 sm:$0xff] }
 0x595   : > { %v1167_v26 = vmul.f32 1.442695, %v1166_v23 }
 0x59d   : > { %v987_v24 = vpop.xlane.xlu0 %986 }
 0x59e   : > { %v988_v25 = vsub.f32 %v981_v18, %v987_v24 }
 0x5a0   : > { %v989_v27 = vmul.f32 1.442695, %v988_v25 }
 0x5a1   : > { %v1343_v28 = vpop.xlane.xlu0 %1342 }
 0x5a2   : > { %1826 = vpow2.f32 %v989_v27  ;;  %v1344_v29 = vsub.f32 %v1337_v13, %v1343_v28 }
 0x5a3   : > { %1828 = vpow2.f32 %v1167_v26 }
 0x5a4   : > { %v1345_v30 = vmul.f32 1.442695, %v1344_v29 }
 0x5a6   : > { %1830 = vpow2.f32 %v1345_v30 }
 0x5ac   : > { %v1827_v31 = vpop.eup %1826 }
 0x5ad   : > { %v991_v32 = vsel %vm739_vm2, %v1827_v31, 0.0  ;;  %v1829_v33 = vpop.eup %1828 }
 0x5ae   : > { %992 = vadd.xlane.f32.xlu0 %v991_v32  ;;  %v1169_v35 = vsel %vm739_vm2, %v1829_v33, 0.0 }
 0x5b0   : > { %v1831_v34 = vpop.eup %1830 }
 0x5b1   : > { %v1347_v36 = vsel %vm739_vm2, %v1831_v34, 0.0 }
 0x5b2   : > { %1170 = vadd.xlane.f32.xlu0 %v1169_v35  ;;  %1348 = vadd.xlane.f32.xlu1 %v1347_v36 }
 0x5c3   : > { %1179 = vrot.lane.b32.xlu1 %v2051_v51, %s1867_s26 }
 0x5c7   : > { %1357 = vrot.lane.b32.xlu1 %v2051_v51, %s1866_s17  ;;  %s1868_s17 = smov 8  }
 0x5c8   : > { %1001 = vrot.lane.b32.xlu0 %v2051_v51, %s1865_s16 }
 0x63b   : > { %v993_v37 = vpop.xlane.xlu0 %992 }
 0x63c   : > { %1832 = vrcp.f32 %v993_v37 }
 0x63f   : > { %v1349_v38 = vpop.xlane.xlu1 %1348  ;;  %v1171_v39 = vpop.xlane.xlu0 %1170 }
 0x640   : > { %1834 = vrcp.f32 %v1349_v38 }
 0x641   : > { %1836 = vrcp.f32 %v1171_v39 }
 0x643   : > { %v1002_v40 = vpop.permute.xlu0 %1001  ;;  %v1180_v52 = vpop.permute.xlu1 %1179 }
 0x644   : > { %1728 = vmatpush3.msra.mxu1 %v1002_v40 }
 0x645   : > { %1737 = vmatprep.subr.mxu1 %v1864_v14 }
 0x646   : > { %v1833_v41 = vpop.eup %1832 }
 0x647   : > { %v995_v42 = vmul.f32 %v1833_v41, %v993_v37  ;;  %v1358_v56 = vpop.permute.xlu1 %1357 }
 0x649   : > { %v996_v43 = vsub.f32 2.0, %v995_v42 }
 0x64a   : > { %v1835_v44 = vpop.eup %1834 }
 0x64b   : > { %v1837_v45 = vpop.eup %1836  ;;  %v997_v46 = vmul.f32 %v1833_v41, %v996_v43  ;;  %v1351_v47 = vmul.f32 %v1835_v44, %v1349_v38 }
 0x64c   : > { %v1173_v48 = vmul.f32 %v1837_v45, %v1171_v39 }
 0x64d   : > { %v998_v49 = vmul.f32 %v1827_v31, %v997_v46  ;;  %v1352_v50 = vsub.f32 2.0, %v1351_v47 }
 0x64e   : > { %v1174_v51 = vsub.f32 2.0, %v1173_v48 }
 0x64f   : > { %1730 = vmatmul.mubr.msk.f32.vlgmr.msra.gmra.mrb[8].mxu1 %vm739_vm2, %v998_v49  ;;  %v1353_v54 = vmul.f32 %v1835_v44, %v1352_v50 }
 0x650   : > { %v1175_v53 = vmul.f32 %v1837_v45, %v1174_v51  ;;  %1738 = vmatpush3.msra.mxu1 %v1180_v52  ;;  %1739 = vmatprep.mubr.msk.f32.mxu1 %vm1863_vm1, %v1864_v14 }
 0x651   : > { %1747 = vmatprep.subr.mxu1 %v1864_v14  ;;  %v1354_v57 = vmul.f32 %v1831_v34, %v1353_v54 }
 0x652   : > { %v1176_v55 = vmul.f32 %v1829_v33, %v1175_v53 }
 0x654   : > { %1740 = vmatmul.mubr.msk.f32.vlgmr.msra.gmra.mrb[10].mxu1 %vm739_vm2, %v1176_v55 }
 0x655   : > { %1748 = vmatpush3.msra.mxu1 %v1358_v56  ;;  %1749 = vmatprep.mubr.msk.f32.mxu1 %vm1863_vm1, %v1864_v14  ;;  %v1443_v14 = vld [vmem:[%s2143_s10 + $0x18] sm:$0xff] }
 0x656   : > { %v1785_v62 = vpack.c.bf16 %v1443_v14, %v1442_v61 }
 0x658   : > { %1750 = vmatmul.mubr.msk.f32.vlgmr.msra.gmra.mrb[12].mxu1 %vm739_vm2, %v1354_v57  ;;  %1786 = vmatpush3.bf16.msra.mxu0 %v1785_v62 }
 0x722   : > { %v1073_v63 = vpop.f32.mrb[8].mxu1 }
 0x723   : > { %1078 = vrot.lane.b32.xlu1 %v1073_v63, %s1868_s17  ;;  %v1731_v1 = vpop.f32.mrb[9].mxu1 }
 0x727   : > { %v1251_v3 = vpop.f32.mrb[10].mxu1 }
 0x728   : > { %1256 = vrot.lane.b32.xlu0 %v1251_v3, %s1869_s18  ;;  %v1741_v4 = vpop.f32.mrb[11].mxu1 }
 0x72b   : > { %v1429_v5 = vpop.f32.mrb[12].mxu1 }
 0x72c   : > { %1434 = vrot.lane.b32.xlu1 %v1429_v5, %s1870_s19  ;;  %v1751_v6 = vpop.f32.mrb[13].mxu1 }
 0x795   : > { %v1079_v7 = vpop.permute.xlu1 %1078 }
 0x796   : > { %1082 = vst.msk [vmem:[#allocation4] sm:$0xff] %vm1081_vm3, %v1079_v7 }
 0x79a   : > { %v1257_v8 = vpop.permute.xlu0 %1256 }
 0x79b   : > { %1260 = vst.msk [vmem:[#allocation4] sm:$0xff] %vm1259_vm4, %v1257_v8 }
 0x79e   : > { %v1435_v2 = vpop.permute.xlu1 %1434 }
 0x79f   : > { %1438 = vst.msk [vmem:[#allocation4] sm:$0xff] %vm1437_vm5, %v1435_v2 }
 0x7a6   : > { %v1439_v9 = vld [vmem:[#allocation4] sm:$0xff] }
 0x7a7   : > { %1761 = vmatmul.mubr.msk.f32.vlgmr.msra.gmra.mrb[8].mxu0 %vm462_vm0, %v1439_v9 }
 0x87a   : > { %v1520_v11 = vpop.f32.mrb[8].mxu0 }
 0x87b   : > { %v1521_v12 = vadd.f32 %v1639_v10, %v1520_v11  ;;  %v1762_v13 = vpop.f32.mrb[9].mxu0 }
 0x87d   : > { %v1524_v15 = vadd.f32 %v1521_v12, %v1960_v0 }
 0x87f   : > { %1525 = vst.msk [vmem:[%s445_s28] sm:$0xff] %vm462_vm0, %v1524_v15 }
 0x880 PF: > { %s22_s23 = sadd.s32 1, %s1860_s23   ;;  %s2146_s21 = smov %s1856_s22 }
 0x881   : > { %p19_p5 = scmp.ge.s32.totalorder %s22_s23, 4   ;;  %s2147_s22 = smov %s2149_s24 }
 0x883   :  { %21 = sbr.rel (!%p19_p5) target bundleno = 2 (0x2), region = 106 }

</bundles_post_ra>
